<compile_context>
chip_gen: v7x
topology: tpu7x:2x2x1
jax: 0.10.0
libtpu: 0.0.40
codegen_flags: <defaults>
</compile_context>

<pallas_src>
import jax
import jax.numpy as jnp
from jax.experimental import pallas as pl
from jax.experimental.pallas import tpu as pltpu


# ------------- recurrent kernel: LSTM1 + LSTM2 fused over a time chunk -------------
def elmo_rnn_kernel(emb_ref, w1ih_ref, w1hh_ref, b1_ref,
                    w2ih_ref, w2hh_ref, b2_ref,
                    x1_ref, x2_ref,
                    xg1_scr, h1, c1, h2, c2):
    @pl.when(pl.program_id(0) == 0)
    def _():
        h1[...] = jnp.zeros_like(h1)
        c1[...] = jnp.zeros_like(c1)
        h2[...] = jnp.zeros_like(h2)
        c2[...] = jnp.zeros_like(c2)

    Tc, Bp, D = emb_ref.shape
    H = h1.shape[-1]

    # Load recurrent weights once; pre-broadcast layer-2 bias outside the time
    # loop (JAX does not CSE broadcast_in_dim).
    w1hh = w1hh_ref[...]                                  # (H, 4H)
    w2ih = w2ih_ref[...]                                  # (H, 4H)
    w2hh = w2hh_ref[...]                                  # (H, 4H)
    b2 = jnp.broadcast_to(b2_ref[...], (Bp, 4 * H))       # (Bp, 4H)

    # Hoist LSTM1's input-to-hidden matmul for the WHOLE chunk out of the
    # serial recurrence: one batched MXU call, bias folded in.
    xg1 = (jnp.dot(emb_ref[...].reshape(Tc * Bp, D), w1ih_ref[...],
                   preferred_element_type=jnp.float32)
           + b1_ref[...])                                  # (Tc*Bp, 4H)
    xg1_scr[...] = xg1.reshape(Tc, Bp, 4 * H)

    def gates_to_hc(gates, c_prev):
        i = jax.nn.sigmoid(gates[:, 0 * H:1 * H])
        f = jax.nn.sigmoid(gates[:, 1 * H:2 * H])
        g = jnp.tanh(gates[:, 2 * H:3 * H])
        o = jax.nn.sigmoid(gates[:, 3 * H:4 * H])
        c_new = f * c_prev + i * g
        h_new = o * jnp.tanh(c_new)
        return h_new, c_new

    def step(s, carry):
        h1v, c1v, h2v, c2v = carry
        # layer 1: input->hidden already computed; only h@Whh on the critical path
        g1 = xg1_scr[s] + jnp.dot(h1v, w1hh, preferred_element_type=jnp.float32)
        h1n, c1n = gates_to_hc(g1, c1v)
        # layer 2: input is h1n (just produced), cannot be hoisted
        g2 = (jnp.dot(h1n, w2ih, preferred_element_type=jnp.float32)
              + jnp.dot(h2v, w2hh, preferred_element_type=jnp.float32) + b2)
        h2n, c2n = gates_to_hc(g2, c2v)
        x1_ref[s] = h1n.astype(x1_ref.dtype)
        x2_ref[s] = h2n.astype(x2_ref.dtype)
        return (h1n, c1n, h2n, c2n)

    carry0 = (h1[...], c1[...], h2[...], c2[...])
    h1v, c1v, h2v, c2v = jax.lax.fori_loop(0, Tc, step, carry0, unroll=True)
    h1[...] = h1v
    c1[...] = c1v
    h2[...] = h2v
    c2[...] = c2v


# ------------- projection kernel: batched Linear over all (t, b) rows -------------
def proj_kernel(x_ref, w_ref, b_ref, o_ref):
    o_ref[...] = (jnp.dot(x_ref[...], w_ref[...],
                          preferred_element_type=jnp.float32)
                  + b_ref[...]).astype(o_ref.dtype)


def _project(x2d, wlin, blin):
    M, H = x2d.shape
    V = wlin.shape[-1]
    tm = M if M <= 512 else 512
    if M % tm != 0:
        tm = M
    grid_spec = pltpu.PrefetchScalarGridSpec(
        num_scalar_prefetch=0,
        grid=(M // tm,),
        in_specs=[
            pl.BlockSpec((tm, H), lambda i: (i, 0)),
            pl.BlockSpec((H, V), lambda i: (0, 0)),
            pl.BlockSpec((1, V), lambda i: (0, 0)),
        ],
        out_specs=pl.BlockSpec((tm, V), lambda i: (i, 0)),
    )
    return pl.pallas_call(
        proj_kernel,
        out_shape=jax.ShapeDtypeStruct((M, V), jnp.float32),
        grid_spec=grid_spec,
        compiler_params=pltpu.CompilerParams(
            dimension_semantics=("parallel",)),
    )(x2d, wlin, blin)


# ---------------- wrapper ----------------
def elmo_forward(x_ids, params, *, time_chunk=None):
    (emb_table, wih1, whh1, b1, wih2, whh2, b2, wlin, blin) = params
    S, B = x_ids.shape
    V, D = emb_table.shape
    H = whh1.shape[-1]
    assert D == H, "module requires embedding_size == hidden_dim == out_size"

    # --- repack weights: gates (i,f,g,o) fused along the last axis so each
    #     gate matmul is a single (In, 4H) lane-dense operand ---
    def fuse_w(w):       # (4, In, H) -> (In, 4H)
        return jnp.transpose(w, (1, 0, 2)).reshape(w.shape[1], 4 * H)

    def fuse_b(b):       # (4, 1, H) -> (1, 4H)
        return jnp.transpose(b, (1, 0, 2)).reshape(1, 4 * H)

    w1ih_f, w1hh_f, b1_f = fuse_w(wih1), fuse_w(whh1), fuse_b(b1)
    w2ih_f, w2hh_f, b2_f = fuse_w(wih2), fuse_w(whh2), fuse_b(b2)

    # glue: embedding gather in plain JAX (data-dependent gather)
    embeddings = jnp.take(emb_table, x_ids, axis=0)              # (S, B, D)

    # pad batch up to a multiple of 8 sublanes for MXU/VPU occupancy
    Bp = max(8, ((B + 7) // 8) * 8)
    emb_p = embeddings if Bp == B else jnp.pad(
        embeddings, ((0, 0), (0, Bp - B), (0, 0)))

    # time chunking: Tc steps per grid iteration (Tc = S -> single grid step)
    Tc = S if (time_chunk is None or S % time_chunk != 0) else time_chunk

    grid_spec = pltpu.PrefetchScalarGridSpec(
        num_scalar_prefetch=0,
        grid=(S // Tc,),
        in_specs=[
            pl.BlockSpec((Tc, Bp, D), lambda t: (t, 0, 0)),        # embeddings chunk
            pl.BlockSpec((D, 4 * H), lambda t: (0, 0)),            # W1 ih (fused gates)
            pl.BlockSpec((H, 4 * H), lambda t: (0, 0)),            # W1 hh
            pl.BlockSpec((1, 4 * H), lambda t: (0, 0)),            # b1
            pl.BlockSpec((H, 4 * H), lambda t: (0, 0)),            # W2 ih
            pl.BlockSpec((H, 4 * H), lambda t: (0, 0)),            # W2 hh
            pl.BlockSpec((1, 4 * H), lambda t: (0, 0)),            # b2
        ],
        out_specs=[
            pl.BlockSpec((Tc, Bp, H), lambda t: (t, 0, 0)),        # x1 chunk
            pl.BlockSpec((Tc, Bp, H), lambda t: (t, 0, 0)),        # x2 chunk
        ],
        scratch_shapes=[
            pltpu.VMEM((Tc, Bp, 4 * H), jnp.float32),              # hoisted x@Wih1 (+b1)
            pltpu.VMEM((Bp, H), jnp.float32),                      # h1
            pltpu.VMEM((Bp, H), jnp.float32),                      # c1
            pltpu.VMEM((Bp, H), jnp.float32),                      # h2
            pltpu.VMEM((Bp, H), jnp.float32),                      # c2
        ],
    )

    x1p, x2p = pl.pallas_call(
        elmo_rnn_kernel,
        out_shape=(
            jax.ShapeDtypeStruct((S, Bp, H), jnp.float32),
            jax.ShapeDtypeStruct((S, Bp, H), jnp.float32),
        ),
        grid_spec=grid_spec,
        compiler_params=pltpu.CompilerParams(
            dimension_semantics=("arbitrary",)),   # sequential recurrence over time
    )(emb_p, w1ih_f, w1hh_f, b1_f, w2ih_f, w2hh_f, b2_f)

    x1 = x1p[:, :B]
    x2 = x2p[:, :B]

    # final Linear, hoisted out of the recurrence into one batched matmul
    logits = _project(x2.reshape(S * B, H), wlin, blin).reshape(S, B, V)
    return logits, (embeddings, x1, x2)


# ---------------- pure-JAX reference (for correctness check) ----------------
def _ref_lstm(xs, wih, whh, b):
    B, H = xs.shape[1], whh.shape[-1]

    def step(carry, x_t):
        h, c = carry
        gates = [x_t @ wih[g] + h @ whh[g] + b[g] for g in range(4)]
        i = jax.nn.sigmoid(gates[0])
        f = jax.nn.sigmoid(gates[1])
        g = jnp.tanh(gates[2])
        o = jax.nn.sigmoid(gates[3])
        c = f * c + i * g
        h = o * jnp.tanh(c)
        return (h, c), h

    init = (jnp.zeros((B, H), jnp.float32), jnp.zeros((B, H), jnp.float32))
    _, ys = jax.lax.scan(step, init, xs)
    return ys


def elmo_reference(x_ids, params):
    (emb_table, wih1, whh1, b1, wih2, whh2, b2, wlin, blin) = params
    embeddings = jnp.take(emb_table, x_ids, axis=0)
    x1 = _ref_lstm(embeddings, wih1, whh1, b1)
    x2 = _ref_lstm(x1, wih2, whh2, b2)
    logits = x2 @ wlin + blin
    return logits, (embeddings, x1, x2)


if __name__ == "__main__":
    # small shapes consistent with the module
    VOCAB = 64
    H = 32          # embedding_size == hidden_dim == out_size (required by module)
    SEQ = 8
    BATCH = 2

    key = jax.random.PRNGKey(0)
    ks = jax.random.split(key, 10)
    bound = 1.0 / jnp.sqrt(H)

    emb_table = jax.random.normal(ks[0], (VOCAB, H), jnp.float32)
    u = lambda k, shape: jax.random.uniform(k, shape, jnp.float32, -bound, bound)
    wih1 = u(ks[1], (4, H, H))
    whh1 = u(ks[2], (4, H, H))
    b1   = u(ks[3], (4, 1, H))
    wih2 = u(ks[4], (4, H, H))
    whh2 = u(ks[5], (4, H, H))
    b2   = u(ks[6], (4, 1, H))
    wlin = u(ks[7], (H, VOCAB))
    blin = u(ks[8], (1, VOCAB))
    params = (emb_table, wih1, whh1, b1, wih2, whh2, b2, wlin, blin)

    x_ids = jax.random.randint(ks[9], (SEQ, BATCH), 0, VOCAB, dtype=jnp.int32)

    logits, (emb, x1, x2) = elmo_forward(x_ids, params)
    jax.block_until_ready((logits, emb, x1, x2))

    ref_logits, (ref_emb, ref_x1, ref_x2) = elmo_reference(x_ids, params)
    assert logits.shape == (SEQ, BATCH, VOCAB)
    assert x1.shape == (SEQ, BATCH, H) and x2.shape == (SEQ, BATCH, H)
    assert jnp.allclose(emb, ref_emb)
    assert jnp.allclose(x1, ref_x1, atol=1e-3, rtol=1e-3)
    assert jnp.allclose(x2, ref_x2, atol=1e-3, rtol=1e-3)
    assert jnp.allclose(logits, ref_logits, atol=1e-3, rtol=1e-3)

    print("KERNEL_OK")
</pallas_src>

<mosaic_0001>
module attributes {stable_mosaic.version = 11 : i64} {
  func.func @elmo_rnn_kernel(%arg0: i32, %arg1: memref<8x8x32xf32, #tpu.memory_space<vmem>>, %arg2: memref<32x128xf32, #tpu.memory_space<vmem>>, %arg3: memref<32x128xf32, #tpu.memory_space<vmem>>, %arg4: memref<1x128xf32, #tpu.memory_space<vmem>>, %arg5: memref<32x128xf32, #tpu.memory_space<vmem>>, %arg6: memref<32x128xf32, #tpu.memory_space<vmem>>, %arg7: memref<1x128xf32, #tpu.memory_space<vmem>>, %arg8: memref<8x8x32xf32, #tpu.memory_space<vmem>>, %arg9: memref<8x8x32xf32, #tpu.memory_space<vmem>>, %arg10: memref<8x8x128xf32, #tpu.memory_space<vmem>>, %arg11: memref<8x32xf32, #tpu.memory_space<vmem>>, %arg12: memref<8x32xf32, #tpu.memory_space<vmem>>, %arg13: memref<8x32xf32, #tpu.memory_space<vmem>>, %arg14: memref<8x32xf32, #tpu.memory_space<vmem>>) attributes {dimension_semantics = [#tpu.dimension_semantics<arbitrary>], iteration_bounds = array<i64: 1>, scalar_prefetch = 0 : i64, scratch_operands = 5 : i64, tpu.core_type = #tpu.core_type<tc>, window_params = [{transform_indices = @transform_0, window_bounds = array<i64: 8, 8, 32>}, {pipeline_mode = #tpu.pipeline_mode<synchronous>, transform_indices = @transform_1, window_bounds = array<i64: 32, 128>}, {pipeline_mode = #tpu.pipeline_mode<synchronous>, transform_indices = @transform_2, window_bounds = array<i64: 32, 128>}, {pipeline_mode = #tpu.pipeline_mode<synchronous>, transform_indices = @transform_3, window_bounds = array<i64: 1, 128>}, {pipeline_mode = #tpu.pipeline_mode<synchronous>, transform_indices = @transform_4, window_bounds = array<i64: 32, 128>}, {pipeline_mode = #tpu.pipeline_mode<synchronous>, transform_indices = @transform_5, window_bounds = array<i64: 32, 128>}, {pipeline_mode = #tpu.pipeline_mode<synchronous>, transform_indices = @transform_6, window_bounds = array<i64: 1, 128>}, {transform_indices = @transform_7, window_bounds = array<i64: 8, 8, 32>}, {transform_indices = @transform_8, window_bounds = array<i64: 8, 8, 32>}]} {
    %c0_i32 = arith.constant 0 : i32
    %0 = arith.cmpi eq, %arg0, %c0_i32 : i32
    %1 = arith.extui %0 : i1 to i32
    %c0_i32_0 = arith.constant 0 : i32
    %2 = arith.cmpi ne, %1, %c0_i32_0 : i32
    scf.if %2 {
      %cst_155 = arith.constant 0.000000e+00 : f32
      %562 = vector.broadcast %cst_155 : f32 to vector<8x32xf32>
      %c0_156 = arith.constant 0 : index
      %c0_157 = arith.constant 0 : index
      %563 = vector.load %arg11[%c0_156, %c0_157] : memref<8x32xf32, #tpu.memory_space<vmem>>, vector<8x32xf32>
      tpu.vector_store %arg11[%c0_156, %c0_157], %562 {strides = array<i32>} : memref<8x32xf32, #tpu.memory_space<vmem>>, vector<8x32xf32>,
      %cst_158 = arith.constant 0.000000e+00 : f32
      %564 = vector.broadcast %cst_158 : f32 to vector<8x32xf32>
      %c0_159 = arith.constant 0 : index
      %c0_160 = arith.constant 0 : index
      %565 = vector.load %arg12[%c0_159, %c0_160] : memref<8x32xf32, #tpu.memory_space<vmem>>, vector<8x32xf32>
      tpu.vector_store %arg12[%c0_159, %c0_160], %564 {strides = array<i32>} : memref<8x32xf32, #tpu.memory_space<vmem>>, vector<8x32xf32>,
      %cst_161 = arith.constant 0.000000e+00 : f32
      %566 = vector.broadcast %cst_161 : f32 to vector<8x32xf32>
      %c0_162 = arith.constant 0 : index
      %c0_163 = arith.constant 0 : index
      %567 = vector.load %arg13[%c0_162, %c0_163] : memref<8x32xf32, #tpu.memory_space<vmem>>, vector<8x32xf32>
      tpu.vector_store %arg13[%c0_162, %c0_163], %566 {strides = array<i32>} : memref<8x32xf32, #tpu.memory_space<vmem>>, vector<8x32xf32>,
      %cst_164 = arith.constant 0.000000e+00 : f32
      %568 = vector.broadcast %cst_164 : f32 to vector<8x32xf32>
      %c0_165 = arith.constant 0 : index
      %c0_166 = arith.constant 0 : index
      %569 = vector.load %arg14[%c0_165, %c0_166] : memref<8x32xf32, #tpu.memory_space<vmem>>, vector<8x32xf32>
      tpu.vector_store %arg14[%c0_165, %c0_166], %568 {strides = array<i32>} : memref<8x32xf32, #tpu.memory_space<vmem>>, vector<8x32xf32>,
    } else {
    }
    %c0 = arith.constant 0 : index
    %c0_1 = arith.constant 0 : index
    %3 = vector.load %arg3[%c0, %c0_1] : memref<32x128xf32, #tpu.memory_space<vmem>>, vector<32x128xf32>
    %c0_2 = arith.constant 0 : index
    %c0_3 = arith.constant 0 : index
    %4 = vector.load %arg5[%c0_2, %c0_3] : memref<32x128xf32, #tpu.memory_space<vmem>>, vector<32x128xf32>
    %c0_4 = arith.constant 0 : index
    %c0_5 = arith.constant 0 : index
    %5 = vector.load %arg6[%c0_4, %c0_5] : memref<32x128xf32, #tpu.memory_space<vmem>>, vector<32x128xf32>
    %c0_6 = arith.constant 0 : index
    %c0_7 = arith.constant 0 : index
    %6 = vector.load %arg7[%c0_6, %c0_7] : memref<1x128xf32, #tpu.memory_space<vmem>>, vector<1x128xf32>
    %7 = vector.shape_cast %6 : vector<1x128xf32> to vector<1x128xf32>
    %8 = vector.broadcast %7 : vector<1x128xf32> to vector<8x128xf32>
    %c0_8 = arith.constant 0 : index
    %c0_9 = arith.constant 0 : index
    %c0_10 = arith.constant 0 : index
    %9 = vector.load %arg1[%c0_8, %c0_9, %c0_10] : memref<8x8x32xf32, #tpu.memory_space<vmem>>, vector<8x8x32xf32>
    %10 = vector.shape_cast %9 : vector<8x8x32xf32> to vector<64x32xf32>
    %c0_11 = arith.constant 0 : index
    %c0_12 = arith.constant 0 : index
    %11 = vector.load %arg2[%c0_11, %c0_12] : memref<32x128xf32, #tpu.memory_space<vmem>>, vector<32x128xf32>
    %cst = arith.constant dense<0.000000e+00> : vector<64x128xf32>
    %12 = tpu.matmul %10, %11, %cst {dimension_numbers = #tpu.dot_dimension_numbers<[1], [0], [0], [1], [0, 0, 1, 1], [], []>} : vector<64x32xf32>, vector<32x128xf32>, vector<64x128xf32> -> vector<64x128xf32>
    %c0_13 = arith.constant 0 : index
    %c0_14 = arith.constant 0 : index
    %13 = vector.load %arg4[%c0_13, %c0_14] : memref<1x128xf32, #tpu.memory_space<vmem>>, vector<1x128xf32>
    %14 = vector.broadcast %13 : vector<1x128xf32> to vector<64x128xf32>
    %15 = arith.addf %12, %14 : vector<64x128xf32>
    %16 = vector.shape_cast %15 : vector<64x128xf32> to vector<8x8x128xf32>
    %c0_15 = arith.constant 0 : index
    %c0_16 = arith.constant 0 : index
    %c0_17 = arith.constant 0 : index
    %17 = vector.load %arg10[%c0_15, %c0_16, %c0_17] : memref<8x8x128xf32, #tpu.memory_space<vmem>>, vector<8x8x128xf32>
    tpu.vector_store %arg10[%c0_15, %c0_16, %c0_17], %16 {strides = array<i32>} : memref<8x8x128xf32, #tpu.memory_space<vmem>>, vector<8x8x128xf32>,
    %c0_18 = arith.constant 0 : index
    %c0_19 = arith.constant 0 : index
    %18 = vector.load %arg11[%c0_18, %c0_19] : memref<8x32xf32, #tpu.memory_space<vmem>>, vector<8x32xf32>
    %c0_20 = arith.constant 0 : index
    %c0_21 = arith.constant 0 : index
    %19 = vector.load %arg12[%c0_20, %c0_21] : memref<8x32xf32, #tpu.memory_space<vmem>>, vector<8x32xf32>
    %c0_22 = arith.constant 0 : index
    %c0_23 = arith.constant 0 : index
    %20 = vector.load %arg13[%c0_22, %c0_23] : memref<8x32xf32, #tpu.memory_space<vmem>>, vector<8x32xf32>
    %c0_24 = arith.constant 0 : index
    %c0_25 = arith.constant 0 : index
    %21 = vector.load %arg14[%c0_24, %c0_25] : memref<8x32xf32, #tpu.memory_space<vmem>>, vector<8x32xf32>
    %c0_i32_26 = arith.constant 0 : i32
    %22 = arith.index_cast %c0_i32_26 : i32 to index
    %c0_27 = arith.constant 0 : index
    %c0_28 = arith.constant 0 : index
    %23 = vector.load %arg10[%22, %c0_27, %c0_28] : memref<8x8x128xf32, #tpu.memory_space<vmem>>, vector<1x8x128xf32>
    %24 = vector.shape_cast %23 : vector<1x8x128xf32> to vector<8x128xf32>
    %cst_29 = arith.constant dense<0.000000e+00> : vector<8x128xf32>
    %25 = tpu.matmul %18, %3, %cst_29 {dimension_numbers = #tpu.dot_dimension_numbers<[1], [0], [0], [1], [0, 0, 1, 1], [], []>} : vector<8x32xf32>, vector<32x128xf32>, vector<8x128xf32> -> vector<8x128xf32>
    %26 = arith.addf %24, %25 : vector<8x128xf32>
    %27 = vector.extract_strided_slice %26 {offsets = [0, 0], sizes = [8, 32], strides = [1, 1]} : vector<8x128xf32> to vector<8x32xf32>
    %28 = arith.negf %27 : vector<8x32xf32>
    %29 = math.exp %28 : vector<8x32xf32>
    %cst_30 = arith.constant 1.000000e+00 : f32
    %30 = vector.broadcast %cst_30 : f32 to vector<8x32xf32>
    %31 = arith.addf %30, %29 : vector<8x32xf32>
    %32 = arith.divf %30, %31 : vector<8x32xf32>
    %33 = vector.extract_strided_slice %26 {offsets = [0, 32], sizes = [8, 32], strides = [1, 1]} : vector<8x128xf32> to vector<8x32xf32>
    %34 = arith.negf %33 : vector<8x32xf32>
    %35 = math.exp %34 : vector<8x32xf32>
    %cst_31 = arith.constant 1.000000e+00 : f32
    %36 = vector.broadcast %cst_31 : f32 to vector<8x32xf32>
    %37 = arith.addf %36, %35 : vector<8x32xf32>
    %38 = arith.divf %36, %37 : vector<8x32xf32>
    %39 = vector.extract_strided_slice %26 {offsets = [0, 64], sizes = [8, 32], strides = [1, 1]} : vector<8x128xf32> to vector<8x32xf32>
    %40 = math.tanh %39 : vector<8x32xf32>
    %41 = vector.extract_strided_slice %26 {offsets = [0, 96], sizes = [8, 32], strides = [1, 1]} : vector<8x128xf32> to vector<8x32xf32>
    %42 = arith.negf %41 : vector<8x32xf32>
    %43 = math.exp %42 : vector<8x32xf32>
    %cst_32 = arith.constant 1.000000e+00 : f32
    %44 = vector.broadcast %cst_32 : f32 to vector<8x32xf32>
    %45 = arith.addf %44, %43 : vector<8x32xf32>
    %46 = arith.divf %44, %45 : vector<8x32xf32>
    %47 = arith.mulf %38, %19 : vector<8x32xf32>
    %48 = arith.mulf %32, %40 : vector<8x32xf32>
    %49 = arith.addf %47, %48 : vector<8x32xf32>
    %50 = math.tanh %49 : vector<8x32xf32>
    %51 = arith.mulf %46, %50 : vector<8x32xf32>
    %cst_33 = arith.constant dense<0.000000e+00> : vector<8x128xf32>
    %52 = tpu.matmul %51, %4, %cst_33 {dimension_numbers = #tpu.dot_dimension_numbers<[1], [0], [0], [1], [0, 0, 1, 1], [], []>} : vector<8x32xf32>, vector<32x128xf32>, vector<8x128xf32> -> vector<8x128xf32>
    %cst_34 = arith.constant dense<0.000000e+00> : vector<8x128xf32>
    %53 = tpu.matmul %20, %5, %cst_34 {dimension_numbers = #tpu.dot_dimension_numbers<[1], [0], [0], [1], [0, 0, 1, 1], [], []>} : vector<8x32xf32>, vector<32x128xf32>, vector<8x128xf32> -> vector<8x128xf32>
    %54 = arith.addf %52, %53 : vector<8x128xf32>
    %55 = arith.addf %54, %8 : vector<8x128xf32>
    %56 = vector.extract_strided_slice %55 {offsets = [0, 0], sizes = [8, 32], strides = [1, 1]} : vector<8x128xf32> to vector<8x32xf32>
    %57 = arith.negf %56 : vector<8x32xf32>
    %58 = math.exp %57 : vector<8x32xf32>
    %cst_35 = arith.constant 1.000000e+00 : f32
    %59 = vector.broadcast %cst_35 : f32 to vector<8x32xf32>
    %60 = arith.addf %59, %58 : vector<8x32xf32>
    %61 = arith.divf %59, %60 : vector<8x32xf32>
    %62 = vector.extract_strided_slice %55 {offsets = [0, 32], sizes = [8, 32], strides = [1, 1]} : vector<8x128xf32> to vector<8x32xf32>
    %63 = arith.negf %62 : vector<8x32xf32>
    %64 = math.exp %63 : vector<8x32xf32>
    %cst_36 = arith.constant 1.000000e+00 : f32
    %65 = vector.broadcast %cst_36 : f32 to vector<8x32xf32>
    %66 = arith.addf %65, %64 : vector<8x32xf32>
    %67 = arith.divf %65, %66 : vector<8x32xf32>
    %68 = vector.extract_strided_slice %55 {offsets = [0, 64], sizes = [8, 32], strides = [1, 1]} : vector<8x128xf32> to vector<8x32xf32>
    %69 = math.tanh %68 : vector<8x32xf32>
    %70 = vector.extract_strided_slice %55 {offsets = [0, 96], sizes = [8, 32], strides = [1, 1]} : vector<8x128xf32> to vector<8x32xf32>
    %71 = arith.negf %70 : vector<8x32xf32>
    %72 = math.exp %71 : vector<8x32xf32>
    %cst_37 = arith.constant 1.000000e+00 : f32
    %73 = vector.broadcast %cst_37 : f32 to vector<8x32xf32>
    %74 = arith.addf %73, %72 : vector<8x32xf32>
    %75 = arith.divf %73, %74 : vector<8x32xf32>
    %76 = arith.mulf %67, %21 : vector<8x32xf32>
    %77 = arith.mulf %61, %69 : vector<8x32xf32>
    %78 = arith.addf %76, %77 : vector<8x32xf32>
    %79 = math.tanh %78 : vector<8x32xf32>
    %80 = arith.mulf %75, %79 : vector<8x32xf32>
    %81 = arith.index_cast %c0_i32_26 : i32 to index
    %c0_38 = arith.constant 0 : index
    %c0_39 = arith.constant 0 : index
    %82 = vector.load %arg8[%81, %c0_38, %c0_39] : memref<8x8x32xf32, #tpu.memory_space<vmem>>, vector<1x8x32xf32>
    %83 = vector.shape_cast %82 : vector<1x8x32xf32> to vector<8x32xf32>
    %84 = vector.shape_cast %51 : vector<8x32xf32> to vector<1x8x32xf32>
    tpu.vector_store %arg8[%81, %c0_38, %c0_39], %84 {strides = array<i32>} : memref<8x8x32xf32, #tpu.memory_space<vmem>>, vector<1x8x32xf32>,
    %85 = arith.index_cast %c0_i32_26 : i32 to index
    %c0_40 = arith.constant 0 : index
    %c0_41 = arith.constant 0 : index
    %86 = vector.load %arg9[%85, %c0_40, %c0_41] : memref<8x8x32xf32, #tpu.memory_space<vmem>>, vector<1x8x32xf32>
    %87 = vector.shape_cast %86 : vector<1x8x32xf32> to vector<8x32xf32>
    %88 = vector.shape_cast %80 : vector<8x32xf32> to vector<1x8x32xf32>
    tpu.vector_store %arg9[%85, %c0_40, %c0_41], %88 {strides = array<i32>} : memref<8x8x32xf32, #tpu.memory_space<vmem>>, vector<1x8x32xf32>,
    %c1_i32 = arith.constant 1 : i32
    %89 = arith.index_cast %c1_i32 : i32 to index
    %c0_42 = arith.constant 0 : index
    %c0_43 = arith.constant 0 : index
    %90 = vector.load %arg10[%89, %c0_42, %c0_43] : memref<8x8x128xf32, #tpu.memory_space<vmem>>, vector<1x8x128xf32>
    %91 = vector.shape_cast %90 : vector<1x8x128xf32> to vector<8x128xf32>
    %cst_44 = arith.constant dense<0.000000e+00> : vector<8x128xf32>
    %92 = tpu.matmul %51, %3, %cst_44 {dimension_numbers = #tpu.dot_dimension_numbers<[1], [0], [0], [1], [0, 0, 1, 1], [], []>} : vector<8x32xf32>, vector<32x128xf32>, vector<8x128xf32> -> vector<8x128xf32>
    %93 = arith.addf %91, %92 : vector<8x128xf32>
    %94 = vector.extract_strided_slice %93 {offsets = [0, 0], sizes = [8, 32], strides = [1, 1]} : vector<8x128xf32> to vector<8x32xf32>
    %95 = arith.negf %94 : vector<8x32xf32>
    %96 = math.exp %95 : vector<8x32xf32>
    %cst_45 = arith.constant 1.000000e+00 : f32
    %97 = vector.broadcast %cst_45 : f32 to vector<8x32xf32>
    %98 = arith.addf %97, %96 : vector<8x32xf32>
    %99 = arith.divf %97, %98 : vector<8x32xf32>
    %100 = vector.extract_strided_slice %93 {offsets = [0, 32], sizes = [8, 32], strides = [1, 1]} : vector<8x128xf32> to vector<8x32xf32>
    %101 = arith.negf %100 : vector<8x32xf32>
    %102 = math.exp %101 : vector<8x32xf32>
    %cst_46 = arith.constant 1.000000e+00 : f32
    %103 = vector.broadcast %cst_46 : f32 to vector<8x32xf32>
    %104 = arith.addf %103, %102 : vector<8x32xf32>
    %105 = arith.divf %103, %104 : vector<8x32xf32>
    %106 = vector.extract_strided_slice %93 {offsets = [0, 64], sizes = [8, 32], strides = [1, 1]} : vector<8x128xf32> to vector<8x32xf32>
    %107 = math.tanh %106 : vector<8x32xf32>
    %108 = vector.extract_strided_slice %93 {offsets = [0, 96], sizes = [8, 32], strides = [1, 1]} : vector<8x128xf32> to vector<8x32xf32>
    %109 = arith.negf %108 : vector<8x32xf32>
    %110 = math.exp %109 : vector<8x32xf32>
    %cst_47 = arith.constant 1.000000e+00 : f32
    %111 = vector.broadcast %cst_47 : f32 to vector<8x32xf32>
    %112 = arith.addf %111, %110 : vector<8x32xf32>
    %113 = arith.divf %111, %112 : vector<8x32xf32>
    %114 = arith.mulf %105, %49 : vector<8x32xf32>
    %115 = arith.mulf %99, %107 : vector<8x32xf32>
    %116 = arith.addf %114, %115 : vector<8x32xf32>
    %117 = math.tanh %116 : vector<8x32xf32>
    %118 = arith.mulf %113, %117 : vector<8x32xf32>
    %cst_48 = arith.constant dense<0.000000e+00> : vector<8x128xf32>
    %119 = tpu.matmul %118, %4, %cst_48 {dimension_numbers = #tpu.dot_dimension_numbers<[1], [0], [0], [1], [0, 0, 1, 1], [], []>} : vector<8x32xf32>, vector<32x128xf32>, vector<8x128xf32> -> vector<8x128xf32>
    %cst_49 = arith.constant dense<0.000000e+00> : vector<8x128xf32>
    %120 = tpu.matmul %80, %5, %cst_49 {dimension_numbers = #tpu.dot_dimension_numbers<[1], [0], [0], [1], [0, 0, 1, 1], [], []>} : vector<8x32xf32>, vector<32x128xf32>, vector<8x128xf32> -> vector<8x128xf32>
    %121 = arith.addf %119, %120 : vector<8x128xf32>
    %122 = arith.addf %121, %8 : vector<8x128xf32>
    %123 = vector.extract_strided_slice %122 {offsets = [0, 0], sizes = [8, 32], strides = [1, 1]} : vector<8x128xf32> to vector<8x32xf32>
    %124 = arith.negf %123 : vector<8x32xf32>
    %125 = math.exp %124 : vector<8x32xf32>
    %cst_50 = arith.constant 1.000000e+00 : f32
    %126 = vector.broadcast %cst_50 : f32 to vector<8x32xf32>
    %127 = arith.addf %126, %125 : vector<8x32xf32>
    %128 = arith.divf %126, %127 : vector<8x32xf32>
    %129 = vector.extract_strided_slice %122 {offsets = [0, 32], sizes = [8, 32], strides = [1, 1]} : vector<8x128xf32> to vector<8x32xf32>
    %130 = arith.negf %129 : vector<8x32xf32>
    %131 = math.exp %130 : vector<8x32xf32>
    %cst_51 = arith.constant 1.000000e+00 : f32
    %132 = vector.broadcast %cst_51 : f32 to vector<8x32xf32>
    %133 = arith.addf %132, %131 : vector<8x32xf32>
    %134 = arith.divf %132, %133 : vector<8x32xf32>
    %135 = vector.extract_strided_slice %122 {offsets = [0, 64], sizes = [8, 32], strides = [1, 1]} : vector<8x128xf32> to vector<8x32xf32>
    %136 = math.tanh %135 : vector<8x32xf32>
    %137 = vector.extract_strided_slice %122 {offsets = [0, 96], sizes = [8, 32], strides = [1, 1]} : vector<8x128xf32> to vector<8x32xf32>
    %138 = arith.negf %137 : vector<8x32xf32>
    %139 = math.exp %138 : vector<8x32xf32>
    %cst_52 = arith.constant 1.000000e+00 : f32
    %140 = vector.broadcast %cst_52 : f32 to vector<8x32xf32>
    %141 = arith.addf %140, %139 : vector<8x32xf32>
    %142 = arith.divf %140, %141 : vector<8x32xf32>
    %143 = arith.mulf %134, %78 : vector<8x32xf32>
    %144 = arith.mulf %128, %136 : vector<8x32xf32>
    %145 = arith.addf %143, %144 : vector<8x32xf32>
    %146 = math.tanh %145 : vector<8x32xf32>
    %147 = arith.mulf %142, %146 : vector<8x32xf32>
    %148 = arith.index_cast %c1_i32 : i32 to index
    %c0_53 = arith.constant 0 : index
    %c0_54 = arith.constant 0 : index
    %149 = vector.load %arg8[%148, %c0_53, %c0_54] : memref<8x8x32xf32, #tpu.memory_space<vmem>>, vector<1x8x32xf32>
    %150 = vector.shape_cast %149 : vector<1x8x32xf32> to vector<8x32xf32>
    %151 = vector.shape_cast %118 : vector<8x32xf32> to vector<1x8x32xf32>
    tpu.vector_store %arg8[%148, %c0_53, %c0_54], %151 {strides = array<i32>} : memref<8x8x32xf32, #tpu.memory_space<vmem>>, vector<1x8x32xf32>,
    %152 = arith.index_cast %c1_i32 : i32 to index
    %c0_55 = arith.constant 0 : index
    %c0_56 = arith.constant 0 : index
    %153 = vector.load %arg9[%152, %c0_55, %c0_56] : memref<8x8x32xf32, #tpu.memory_space<vmem>>, vector<1x8x32xf32>
    %154 = vector.shape_cast %153 : vector<1x8x32xf32> to vector<8x32xf32>
    %155 = vector.shape_cast %147 : vector<8x32xf32> to vector<1x8x32xf32>
    tpu.vector_store %arg9[%152, %c0_55, %c0_56], %155 {strides = array<i32>} : memref<8x8x32xf32, #tpu.memory_space<vmem>>, vector<1x8x32xf32>,
    %c2_i32 = arith.constant 2 : i32
    %156 = arith.index_cast %c2_i32 : i32 to index
    %c0_57 = arith.constant 0 : index
    %c0_58 = arith.constant 0 : index
    %157 = vector.load %arg10[%156, %c0_57, %c0_58] : memref<8x8x128xf32, #tpu.memory_space<vmem>>, vector<1x8x128xf32>
    %158 = vector.shape_cast %157 : vector<1x8x128xf32> to vector<8x128xf32>
    %cst_59 = arith.constant dense<0.000000e+00> : vector<8x128xf32>
    %159 = tpu.matmul %118, %3, %cst_59 {dimension_numbers = #tpu.dot_dimension_numbers<[1], [0], [0], [1], [0, 0, 1, 1], [], []>} : vector<8x32xf32>, vector<32x128xf32>, vector<8x128xf32> -> vector<8x128xf32>
    %160 = arith.addf %158, %159 : vector<8x128xf32>
    %161 = vector.extract_strided_slice %160 {offsets = [0, 0], sizes = [8, 32], strides = [1, 1]} : vector<8x128xf32> to vector<8x32xf32>
    %162 = arith.negf %161 : vector<8x32xf32>
    %163 = math.exp %162 : vector<8x32xf32>
    %cst_60 = arith.constant 1.000000e+00 : f32
    %164 = vector.broadcast %cst_60 : f32 to vector<8x32xf32>
    %165 = arith.addf %164, %163 : vector<8x32xf32>
    %166 = arith.divf %164, %165 : vector<8x32xf32>
    %167 = vector.extract_strided_slice %160 {offsets = [0, 32], sizes = [8, 32], strides = [1, 1]} : vector<8x128xf32> to vector<8x32xf32>
    %168 = arith.negf %167 : vector<8x32xf32>
    %169 = math.exp %168 : vector<8x32xf32>
    %cst_61 = arith.constant 1.000000e+00 : f32
    %170 = vector.broadcast %cst_61 : f32 to vector<8x32xf32>
    %171 = arith.addf %170, %169 : vector<8x32xf32>
    %172 = arith.divf %170, %171 : vector<8x32xf32>
    %173 = vector.extract_strided_slice %160 {offsets = [0, 64], sizes = [8, 32], strides = [1, 1]} : vector<8x128xf32> to vector<8x32xf32>
    %174 = math.tanh %173 : vector<8x32xf32>
    %175 = vector.extract_strided_slice %160 {offsets = [0, 96], sizes = [8, 32], strides = [1, 1]} : vector<8x128xf32> to vector<8x32xf32>
    %176 = arith.negf %175 : vector<8x32xf32>
    %177 = math.exp %176 : vector<8x32xf32>
    %cst_62 = arith.constant 1.000000e+00 : f32
    %178 = vector.broadcast %cst_62 : f32 to vector<8x32xf32>
    %179 = arith.addf %178, %177 : vector<8x32xf32>
    %180 = arith.divf %178, %179 : vector<8x32xf32>
    %181 = arith.mulf %172, %116 : vector<8x32xf32>
    %182 = arith.mulf %166, %174 : vector<8x32xf32>
    %183 = arith.addf %181, %182 : vector<8x32xf32>
    %184 = math.tanh %183 : vector<8x32xf32>
    %185 = arith.mulf %180, %184 : vector<8x32xf32>
    %cst_63 = arith.constant dense<0.000000e+00> : vector<8x128xf32>
    %186 = tpu.matmul %185, %4, %cst_63 {dimension_numbers = #tpu.dot_dimension_numbers<[1], [0], [0], [1], [0, 0, 1, 1], [], []>} : vector<8x32xf32>, vector<32x128xf32>, vector<8x128xf32> -> vector<8x128xf32>
    %cst_64 = arith.constant dense<0.000000e+00> : vector<8x128xf32>
    %187 = tpu.matmul %147, %5, %cst_64 {dimension_numbers = #tpu.dot_dimension_numbers<[1], [0], [0], [1], [0, 0, 1, 1], [], []>} : vector<8x32xf32>, vector<32x128xf32>, vector<8x128xf32> -> vector<8x128xf32>
    %188 = arith.addf %186, %187 : vector<8x128xf32>
    %189 = arith.addf %188, %8 : vector<8x128xf32>
    %190 = vector.extract_strided_slice %189 {offsets = [0, 0], sizes = [8, 32], strides = [1, 1]} : vector<8x128xf32> to vector<8x32xf32>
    %191 = arith.negf %190 : vector<8x32xf32>
    %192 = math.exp %191 : vector<8x32xf32>
    %cst_65 = arith.constant 1.000000e+00 : f32
    %193 = vector.broadcast %cst_65 : f32 to vector<8x32xf32>
    %194 = arith.addf %193, %192 : vector<8x32xf32>
    %195 = arith.divf %193, %194 : vector<8x32xf32>
    %196 = vector.extract_strided_slice %189 {offsets = [0, 32], sizes = [8, 32], strides = [1, 1]} : vector<8x128xf32> to vector<8x32xf32>
    %197 = arith.negf %196 : vector<8x32xf32>
    %198 = math.exp %197 : vector<8x32xf32>
    %cst_66 = arith.constant 1.000000e+00 : f32
    %199 = vector.broadcast %cst_66 : f32 to vector<8x32xf32>
    %200 = arith.addf %199, %198 : vector<8x32xf32>
    %201 = arith.divf %199, %200 : vector<8x32xf32>
    %202 = vector.extract_strided_slice %189 {offsets = [0, 64], sizes = [8, 32], strides = [1, 1]} : vector<8x128xf32> to vector<8x32xf32>
    %203 = math.tanh %202 : vector<8x32xf32>
    %204 = vector.extract_strided_slice %189 {offsets = [0, 96], sizes = [8, 32], strides = [1, 1]} : vector<8x128xf32> to vector<8x32xf32>
    %205 = arith.negf %204 : vector<8x32xf32>
    %206 = math.exp %205 : vector<8x32xf32>
    %cst_67 = arith.constant 1.000000e+00 : f32
    %207 = vector.broadcast %cst_67 : f32 to vector<8x32xf32>
    %208 = arith.addf %207, %206 : vector<8x32xf32>
    %209 = arith.divf %207, %208 : vector<8x32xf32>
    %210 = arith.mulf %201, %145 : vector<8x32xf32>
    %211 = arith.mulf %195, %203 : vector<8x32xf32>
    %212 = arith.addf %210, %211 : vector<8x32xf32>
    %213 = math.tanh %212 : vector<8x32xf32>
    %214 = arith.mulf %209, %213 : vector<8x32xf32>
    %215 = arith.index_cast %c2_i32 : i32 to index
    %c0_68 = arith.constant 0 : index
    %c0_69 = arith.constant 0 : index
    %216 = vector.load %arg8[%215, %c0_68, %c0_69] : memref<8x8x32xf32, #tpu.memory_space<vmem>>, vector<1x8x32xf32>
    %217 = vector.shape_cast %216 : vector<1x8x32xf32> to vector<8x32xf32>
    %218 = vector.shape_cast %185 : vector<8x32xf32> to vector<1x8x32xf32>
    tpu.vector_store %arg8[%215, %c0_68, %c0_69], %218 {strides = array<i32>} : memref<8x8x32xf32, #tpu.memory_space<vmem>>, vector<1x8x32xf32>,
    %219 = arith.index_cast %c2_i32 : i32 to index
    %c0_70 = arith.constant 0 : index
    %c0_71 = arith.constant 0 : index
    %220 = vector.load %arg9[%219, %c0_70, %c0_71] : memref<8x8x32xf32, #tpu.memory_space<vmem>>, vector<1x8x32xf32>
    %221 = vector.shape_cast %220 : vector<1x8x32xf32> to vector<8x32xf32>
    %222 = vector.shape_cast %214 : vector<8x32xf32> to vector<1x8x32xf32>
    tpu.vector_store %arg9[%219, %c0_70, %c0_71], %222 {strides = array<i32>} : memref<8x8x32xf32, #tpu.memory_space<vmem>>, vector<1x8x32xf32>,
    %c3_i32 = arith.constant 3 : i32
    %223 = arith.index_cast %c3_i32 : i32 to index
    %c0_72 = arith.constant 0 : index
    %c0_73 = arith.constant 0 : index
    %224 = vector.load %arg10[%223, %c0_72, %c0_73] : memref<8x8x128xf32, #tpu.memory_space<vmem>>, vector<1x8x128xf32>
    %225 = vector.shape_cast %224 : vector<1x8x128xf32> to vector<8x128xf32>
    %cst_74 = arith.constant dense<0.000000e+00> : vector<8x128xf32>
    %226 = tpu.matmul %185, %3, %cst_74 {dimension_numbers = #tpu.dot_dimension_numbers<[1], [0], [0], [1], [0, 0, 1, 1], [], []>} : vector<8x32xf32>, vector<32x128xf32>, vector<8x128xf32> -> vector<8x128xf32>
    %227 = arith.addf %225, %226 : vector<8x128xf32>
    %228 = vector.extract_strided_slice %227 {offsets = [0, 0], sizes = [8, 32], strides = [1, 1]} : vector<8x128xf32> to vector<8x32xf32>
    %229 = arith.negf %228 : vector<8x32xf32>
    %230 = math.exp %229 : vector<8x32xf32>
    %cst_75 = arith.constant 1.000000e+00 : f32
    %231 = vector.broadcast %cst_75 : f32 to vector<8x32xf32>
    %232 = arith.addf %231, %230 : vector<8x32xf32>
    %233 = arith.divf %231, %232 : vector<8x32xf32>
    %234 = vector.extract_strided_slice %227 {offsets = [0, 32], sizes = [8, 32], strides = [1, 1]} : vector<8x128xf32> to vector<8x32xf32>
    %235 = arith.negf %234 : vector<8x32xf32>
    %236 = math.exp %235 : vector<8x32xf32>
    %cst_76 = arith.constant 1.000000e+00 : f32
    %237 = vector.broadcast %cst_76 : f32 to vector<8x32xf32>
    %238 = arith.addf %237, %236 : vector<8x32xf32>
    %239 = arith.divf %237, %238 : vector<8x32xf32>
    %240 = vector.extract_strided_slice %227 {offsets = [0, 64], sizes = [8, 32], strides = [1, 1]} : vector<8x128xf32> to vector<8x32xf32>
    %241 = math.tanh %240 : vector<8x32xf32>
    %242 = vector.extract_strided_slice %227 {offsets = [0, 96], sizes = [8, 32], strides = [1, 1]} : vector<8x128xf32> to vector<8x32xf32>
    %243 = arith.negf %242 : vector<8x32xf32>
    %244 = math.exp %243 : vector<8x32xf32>
    %cst_77 = arith.constant 1.000000e+00 : f32
    %245 = vector.broadcast %cst_77 : f32 to vector<8x32xf32>
    %246 = arith.addf %245, %244 : vector<8x32xf32>
    %247 = arith.divf %245, %246 : vector<8x32xf32>
    %248 = arith.mulf %239, %183 : vector<8x32xf32>
    %249 = arith.mulf %233, %241 : vector<8x32xf32>
    %250 = arith.addf %248, %249 : vector<8x32xf32>
    %251 = math.tanh %250 : vector<8x32xf32>
    %252 = arith.mulf %247, %251 : vector<8x32xf32>
    %cst_78 = arith.constant dense<0.000000e+00> : vector<8x128xf32>
    %253 = tpu.matmul %252, %4, %cst_78 {dimension_numbers = #tpu.dot_dimension_numbers<[1], [0], [0], [1], [0, 0, 1, 1], [], []>} : vector<8x32xf32>, vector<32x128xf32>, vector<8x128xf32> -> vector<8x128xf32>
    %cst_79 = arith.constant dense<0.000000e+00> : vector<8x128xf32>
    %254 = tpu.matmul %214, %5, %cst_79 {dimension_numbers = #tpu.dot_dimension_numbers<[1], [0], [0], [1], [0, 0, 1, 1], [], []>} : vector<8x32xf32>, vector<32x128xf32>, vector<8x128xf32> -> vector<8x128xf32>
    %255 = arith.addf %253, %254 : vector<8x128xf32>
    %256 = arith.addf %255, %8 : vector<8x128xf32>
    %257 = vector.extract_strided_slice %256 {offsets = [0, 0], sizes = [8, 32], strides = [1, 1]} : vector<8x128xf32> to vector<8x32xf32>
    %258 = arith.negf %257 : vector<8x32xf32>
    %259 = math.exp %258 : vector<8x32xf32>
    %cst_80 = arith.constant 1.000000e+00 : f32
    %260 = vector.broadcast %cst_80 : f32 to vector<8x32xf32>
    %261 = arith.addf %260, %259 : vector<8x32xf32>
    %262 = arith.divf %260, %261 : vector<8x32xf32>
    %263 = vector.extract_strided_slice %256 {offsets = [0, 32], sizes = [8, 32], strides = [1, 1]} : vector<8x128xf32> to vector<8x32xf32>
    %264 = arith.negf %263 : vector<8x32xf32>
    %265 = math.exp %264 : vector<8x32xf32>
    %cst_81 = arith.constant 1.000000e+00 : f32
    %266 = vector.broadcast %cst_81 : f32 to vector<8x32xf32>
    %267 = arith.addf %266, %265 : vector<8x32xf32>
    %268 = arith.divf %266, %267 : vector<8x32xf32>
    %269 = vector.extract_strided_slice %256 {offsets = [0, 64], sizes = [8, 32], strides = [1, 1]} : vector<8x128xf32> to vector<8x32xf32>
    %270 = math.tanh %269 : vector<8x32xf32>
    %271 = vector.extract_strided_slice %256 {offsets = [0, 96], sizes = [8, 32], strides = [1, 1]} : vector<8x128xf32> to vector<8x32xf32>
    %272 = arith.negf %271 : vector<8x32xf32>
    %273 = math.exp %272 : vector<8x32xf32>
    %cst_82 = arith.constant 1.000000e+00 : f32
    %274 = vector.broadcast %cst_82 : f32 to vector<8x32xf32>
    %275 = arith.addf %274, %273 : vector<8x32xf32>
    %276 = arith.divf %274, %275 : vector<8x32xf32>
    %277 = arith.mulf %268, %212 : vector<8x32xf32>
    %278 = arith.mulf %262, %270 : vector<8x32xf32>
    %279 = arith.addf %277, %278 : vector<8x32xf32>
    %280 = math.tanh %279 : vector<8x32xf32>
    %281 = arith.mulf %276, %280 : vector<8x32xf32>
    %282 = arith.index_cast %c3_i32 : i32 to index
    %c0_83 = arith.constant 0 : index
    %c0_84 = arith.constant 0 : index
    %283 = vector.load %arg8[%282, %c0_83, %c0_84] : memref<8x8x32xf32, #tpu.memory_space<vmem>>, vector<1x8x32xf32>
    %284 = vector.shape_cast %283 : vector<1x8x32xf32> to vector<8x32xf32>
    %285 = vector.shape_cast %252 : vector<8x32xf32> to vector<1x8x32xf32>
    tpu.vector_store %arg8[%282, %c0_83, %c0_84], %285 {strides = array<i32>} : memref<8x8x32xf32, #tpu.memory_space<vmem>>, vector<1x8x32xf32>,
    %286 = arith.index_cast %c3_i32 : i32 to index
    %c0_85 = arith.constant 0 : index
    %c0_86 = arith.constant 0 : index
    %287 = vector.load %arg9[%286, %c0_85, %c0_86] : memref<8x8x32xf32, #tpu.memory_space<vmem>>, vector<1x8x32xf32>
    %288 = vector.shape_cast %287 : vector<1x8x32xf32> to vector<8x32xf32>
    %289 = vector.shape_cast %281 : vector<8x32xf32> to vector<1x8x32xf32>
    tpu.vector_store %arg9[%286, %c0_85, %c0_86], %289 {strides = array<i32>} : memref<8x8x32xf32, #tpu.memory_space<vmem>>, vector<1x8x32xf32>,
    %c4_i32 = arith.constant 4 : i32
    %290 = arith.index_cast %c4_i32 : i32 to index
    %c0_87 = arith.constant 0 : index
    %c0_88 = arith.constant 0 : index
    %291 = vector.load %arg10[%290, %c0_87, %c0_88] : memref<8x8x128xf32, #tpu.memory_space<vmem>>, vector<1x8x128xf32>
    %292 = vector.shape_cast %291 : vector<1x8x128xf32> to vector<8x128xf32>
    %cst_89 = arith.constant dense<0.000000e+00> : vector<8x128xf32>
    %293 = tpu.matmul %252, %3, %cst_89 {dimension_numbers = #tpu.dot_dimension_numbers<[1], [0], [0], [1], [0, 0, 1, 1], [], []>} : vector<8x32xf32>, vector<32x128xf32>, vector<8x128xf32> -> vector<8x128xf32>
    %294 = arith.addf %292, %293 : vector<8x128xf32>
    %295 = vector.extract_strided_slice %294 {offsets = [0, 0], sizes = [8, 32], strides = [1, 1]} : vector<8x128xf32> to vector<8x32xf32>
    %296 = arith.negf %295 : vector<8x32xf32>
    %297 = math.exp %296 : vector<8x32xf32>
    %cst_90 = arith.constant 1.000000e+00 : f32
    %298 = vector.broadcast %cst_90 : f32 to vector<8x32xf32>
    %299 = arith.addf %298, %297 : vector<8x32xf32>
    %300 = arith.divf %298, %299 : vector<8x32xf32>
    %301 = vector.extract_strided_slice %294 {offsets = [0, 32], sizes = [8, 32], strides = [1, 1]} : vector<8x128xf32> to vector<8x32xf32>
    %302 = arith.negf %301 : vector<8x32xf32>
    %303 = math.exp %302 : vector<8x32xf32>
    %cst_91 = arith.constant 1.000000e+00 : f32
    %304 = vector.broadcast %cst_91 : f32 to vector<8x32xf32>
    %305 = arith.addf %304, %303 : vector<8x32xf32>
    %306 = arith.divf %304, %305 : vector<8x32xf32>
    %307 = vector.extract_strided_slice %294 {offsets = [0, 64], sizes = [8, 32], strides = [1, 1]} : vector<8x128xf32> to vector<8x32xf32>
    %308 = math.tanh %307 : vector<8x32xf32>
    %309 = vector.extract_strided_slice %294 {offsets = [0, 96], sizes = [8, 32], strides = [1, 1]} : vector<8x128xf32> to vector<8x32xf32>
    %310 = arith.negf %309 : vector<8x32xf32>
    %311 = math.exp %310 : vector<8x32xf32>
    %cst_92 = arith.constant 1.000000e+00 : f32
    %312 = vector.broadcast %cst_92 : f32 to vector<8x32xf32>
    %313 = arith.addf %312, %311 : vector<8x32xf32>
    %314 = arith.divf %312, %313 : vector<8x32xf32>
    %315 = arith.mulf %306, %250 : vector<8x32xf32>
    %316 = arith.mulf %300, %308 : vector<8x32xf32>
    %317 = arith.addf %315, %316 : vector<8x32xf32>
    %318 = math.tanh %317 : vector<8x32xf32>
    %319 = arith.mulf %314, %318 : vector<8x32xf32>
    %cst_93 = arith.constant dense<0.000000e+00> : vector<8x128xf32>
    %320 = tpu.matmul %319, %4, %cst_93 {dimension_numbers = #tpu.dot_dimension_numbers<[1], [0], [0], [1], [0, 0, 1, 1], [], []>} : vector<8x32xf32>, vector<32x128xf32>, vector<8x128xf32> -> vector<8x128xf32>
    %cst_94 = arith.constant dense<0.000000e+00> : vector<8x128xf32>
    %321 = tpu.matmul %281, %5, %cst_94 {dimension_numbers = #tpu.dot_dimension_numbers<[1], [0], [0], [1], [0, 0, 1, 1], [], []>} : vector<8x32xf32>, vector<32x128xf32>, vector<8x128xf32> -> vector<8x128xf32>
    %322 = arith.addf %320, %321 : vector<8x128xf32>
    %323 = arith.addf %322, %8 : vector<8x128xf32>
    %324 = vector.extract_strided_slice %323 {offsets = [0, 0], sizes = [8, 32], strides = [1, 1]} : vector<8x128xf32> to vector<8x32xf32>
    %325 = arith.negf %324 : vector<8x32xf32>
    %326 = math.exp %325 : vector<8x32xf32>
    %cst_95 = arith.constant 1.000000e+00 : f32
    %327 = vector.broadcast %cst_95 : f32 to vector<8x32xf32>
    %328 = arith.addf %327, %326 : vector<8x32xf32>
    %329 = arith.divf %327, %328 : vector<8x32xf32>
    %330 = vector.extract_strided_slice %323 {offsets = [0, 32], sizes = [8, 32], strides = [1, 1]} : vector<8x128xf32> to vector<8x32xf32>
    %331 = arith.negf %330 : vector<8x32xf32>
    %332 = math.exp %331 : vector<8x32xf32>
    %cst_96 = arith.constant 1.000000e+00 : f32
    %333 = vector.broadcast %cst_96 : f32 to vector<8x32xf32>
    %334 = arith.addf %333, %332 : vector<8x32xf32>
    %335 = arith.divf %333, %334 : vector<8x32xf32>
    %336 = vector.extract_strided_slice %323 {offsets = [0, 64], sizes = [8, 32], strides = [1, 1]} : vector<8x128xf32> to vector<8x32xf32>
    %337 = math.tanh %336 : vector<8x32xf32>
    %338 = vector.extract_strided_slice %323 {offsets = [0, 96], sizes = [8, 32], strides = [1, 1]} : vector<8x128xf32> to vector<8x32xf32>
    %339 = arith.negf %338 : vector<8x32xf32>
    %340 = math.exp %339 : vector<8x32xf32>
    %cst_97 = arith.constant 1.000000e+00 : f32
    %341 = vector.broadcast %cst_97 : f32 to vector<8x32xf32>
    %342 = arith.addf %341, %340 : vector<8x32xf32>
    %343 = arith.divf %341, %342 : vector<8x32xf32>
    %344 = arith.mulf %335, %279 : vector<8x32xf32>
    %345 = arith.mulf %329, %337 : vector<8x32xf32>
    %346 = arith.addf %344, %345 : vector<8x32xf32>
    %347 = math.tanh %346 : vector<8x32xf32>
    %348 = arith.mulf %343, %347 : vector<8x32xf32>
    %349 = arith.index_cast %c4_i32 : i32 to index
    %c0_98 = arith.constant 0 : index
    %c0_99 = arith.constant 0 : index
    %350 = vector.load %arg8[%349, %c0_98, %c0_99] : memref<8x8x32xf32, #tpu.memory_space<vmem>>, vector<1x8x32xf32>
    %351 = vector.shape_cast %350 : vector<1x8x32xf32> to vector<8x32xf32>
    %352 = vector.shape_cast %319 : vector<8x32xf32> to vector<1x8x32xf32>
    tpu.vector_store %arg8[%349, %c0_98, %c0_99], %352 {strides = array<i32>} : memref<8x8x32xf32, #tpu.memory_space<vmem>>, vector<1x8x32xf32>,
    %353 = arith.index_cast %c4_i32 : i32 to index
    %c0_100 = arith.constant 0 : index
    %c0_101 = arith.constant 0 : index
    %354 = vector.load %arg9[%353, %c0_100, %c0_101] : memref<8x8x32xf32, #tpu.memory_space<vmem>>, vector<1x8x32xf32>
    %355 = vector.shape_cast %354 : vector<1x8x32xf32> to vector<8x32xf32>
    %356 = vector.shape_cast %348 : vector<8x32xf32> to vector<1x8x32xf32>
    tpu.vector_store %arg9[%353, %c0_100, %c0_101], %356 {strides = array<i32>} : memref<8x8x32xf32, #tpu.memory_space<vmem>>, vector<1x8x32xf32>,
    %c5_i32 = arith.constant 5 : i32
    %357 = arith.index_cast %c5_i32 : i32 to index
    %c0_102 = arith.constant 0 : index
    %c0_103 = arith.constant 0 : index
    %358 = vector.load %arg10[%357, %c0_102, %c0_103] : memref<8x8x128xf32, #tpu.memory_space<vmem>>, vector<1x8x128xf32>
    %359 = vector.shape_cast %358 : vector<1x8x128xf32> to vector<8x128xf32>
    %cst_104 = arith.constant dense<0.000000e+00> : vector<8x128xf32>
    %360 = tpu.matmul %319, %3, %cst_104 {dimension_numbers = #tpu.dot_dimension_numbers<[1], [0], [0], [1], [0, 0, 1, 1], [], []>} : vector<8x32xf32>, vector<32x128xf32>, vector<8x128xf32> -> vector<8x128xf32>
    %361 = arith.addf %359, %360 : vector<8x128xf32>
    %362 = vector.extract_strided_slice %361 {offsets = [0, 0], sizes = [8, 32], strides = [1, 1]} : vector<8x128xf32> to vector<8x32xf32>
    %363 = arith.negf %362 : vector<8x32xf32>
    %364 = math.exp %363 : vector<8x32xf32>
    %cst_105 = arith.constant 1.000000e+00 : f32
    %365 = vector.broadcast %cst_105 : f32 to vector<8x32xf32>
    %366 = arith.addf %365, %364 : vector<8x32xf32>
    %367 = arith.divf %365, %366 : vector<8x32xf32>
    %368 = vector.extract_strided_slice %361 {offsets = [0, 32], sizes = [8, 32], strides = [1, 1]} : vector<8x128xf32> to vector<8x32xf32>
    %369 = arith.negf %368 : vector<8x32xf32>
    %370 = math.exp %369 : vector<8x32xf32>
    %cst_106 = arith.constant 1.000000e+00 : f32
    %371 = vector.broadcast %cst_106 : f32 to vector<8x32xf32>
    %372 = arith.addf %371, %370 : vector<8x32xf32>
    %373 = arith.divf %371, %372 : vector<8x32xf32>
    %374 = vector.extract_strided_slice %361 {offsets = [0, 64], sizes = [8, 32], strides = [1, 1]} : vector<8x128xf32> to vector<8x32xf32>
    %375 = math.tanh %374 : vector<8x32xf32>
    %376 = vector.extract_strided_slice %361 {offsets = [0, 96], sizes = [8, 32], strides = [1, 1]} : vector<8x128xf32> to vector<8x32xf32>
    %377 = arith.negf %376 : vector<8x32xf32>
    %378 = math.exp %377 : vector<8x32xf32>
    %cst_107 = arith.constant 1.000000e+00 : f32
    %379 = vector.broadcast %cst_107 : f32 to vector<8x32xf32>
    %380 = arith.addf %379, %378 : vector<8x32xf32>
    %381 = arith.divf %379, %380 : vector<8x32xf32>
    %382 = arith.mulf %373, %317 : vector<8x32xf32>
    %383 = arith.mulf %367, %375 : vector<8x32xf32>
    %384 = arith.addf %382, %383 : vector<8x32xf32>
    %385 = math.tanh %384 : vector<8x32xf32>
    %386 = arith.mulf %381, %385 : vector<8x32xf32>
    %cst_108 = arith.constant dense<0.000000e+00> : vector<8x128xf32>
    %387 = tpu.matmul %386, %4, %cst_108 {dimension_numbers = #tpu.dot_dimension_numbers<[1], [0], [0], [1], [0, 0, 1, 1], [], []>} : vector<8x32xf32>, vector<32x128xf32>, vector<8x128xf32> -> vector<8x128xf32>
    %cst_109 = arith.constant dense<0.000000e+00> : vector<8x128xf32>
    %388 = tpu.matmul %348, %5, %cst_109 {dimension_numbers = #tpu.dot_dimension_numbers<[1], [0], [0], [1], [0, 0, 1, 1], [], []>} : vector<8x32xf32>, vector<32x128xf32>, vector<8x128xf32> -> vector<8x128xf32>
    %389 = arith.addf %387, %388 : vector<8x128xf32>
    %390 = arith.addf %389, %8 : vector<8x128xf32>
    %391 = vector.extract_strided_slice %390 {offsets = [0, 0], sizes = [8, 32], strides = [1, 1]} : vector<8x128xf32> to vector<8x32xf32>
    %392 = arith.negf %391 : vector<8x32xf32>
    %393 = math.exp %392 : vector<8x32xf32>
    %cst_110 = arith.constant 1.000000e+00 : f32
    %394 = vector.broadcast %cst_110 : f32 to vector<8x32xf32>
    %395 = arith.addf %394, %393 : vector<8x32xf32>
    %396 = arith.divf %394, %395 : vector<8x32xf32>
    %397 = vector.extract_strided_slice %390 {offsets = [0, 32], sizes = [8, 32], strides = [1, 1]} : vector<8x128xf32> to vector<8x32xf32>
    %398 = arith.negf %397 : vector<8x32xf32>
    %399 = math.exp %398 : vector<8x32xf32>
    %cst_111 = arith.constant 1.000000e+00 : f32
    %400 = vector.broadcast %cst_111 : f32 to vector<8x32xf32>
    %401 = arith.addf %400, %399 : vector<8x32xf32>
    %402 = arith.divf %400, %401 : vector<8x32xf32>
    %403 = vector.extract_strided_slice %390 {offsets = [0, 64], sizes = [8, 32], strides = [1, 1]} : vector<8x128xf32> to vector<8x32xf32>
    %404 = math.tanh %403 : vector<8x32xf32>
    %405 = vector.extract_strided_slice %390 {offsets = [0, 96], sizes = [8, 32], strides = [1, 1]} : vector<8x128xf32> to vector<8x32xf32>
    %406 = arith.negf %405 : vector<8x32xf32>
    %407 = math.exp %406 : vector<8x32xf32>
    %cst_112 = arith.constant 1.000000e+00 : f32
    %408 = vector.broadcast %cst_112 : f32 to vector<8x32xf32>
    %409 = arith.addf %408, %407 : vector<8x32xf32>
    %410 = arith.divf %408, %409 : vector<8x32xf32>
    %411 = arith.mulf %402, %346 : vector<8x32xf32>
    %412 = arith.mulf %396, %404 : vector<8x32xf32>
    %413 = arith.addf %411, %412 : vector<8x32xf32>
    %414 = math.tanh %413 : vector<8x32xf32>
    %415 = arith.mulf %410, %414 : vector<8x32xf32>
    %416 = arith.index_cast %c5_i32 : i32 to index
    %c0_113 = arith.constant 0 : index
    %c0_114 = arith.constant 0 : index
    %417 = vector.load %arg8[%416, %c0_113, %c0_114] : memref<8x8x32xf32, #tpu.memory_space<vmem>>, vector<1x8x32xf32>
    %418 = vector.shape_cast %417 : vector<1x8x32xf32> to vector<8x32xf32>
    %419 = vector.shape_cast %386 : vector<8x32xf32> to vector<1x8x32xf32>
    tpu.vector_store %arg8[%416, %c0_113, %c0_114], %419 {strides = array<i32>} : memref<8x8x32xf32, #tpu.memory_space<vmem>>, vector<1x8x32xf32>,
    %420 = arith.index_cast %c5_i32 : i32 to index
    %c0_115 = arith.constant 0 : index
    %c0_116 = arith.constant 0 : index
    %421 = vector.load %arg9[%420, %c0_115, %c0_116] : memref<8x8x32xf32, #tpu.memory_space<vmem>>, vector<1x8x32xf32>
    %422 = vector.shape_cast %421 : vector<1x8x32xf32> to vector<8x32xf32>
    %423 = vector.shape_cast %415 : vector<8x32xf32> to vector<1x8x32xf32>
    tpu.vector_store %arg9[%420, %c0_115, %c0_116], %423 {strides = array<i32>} : memref<8x8x32xf32, #tpu.memory_space<vmem>>, vector<1x8x32xf32>,
    %c6_i32 = arith.constant 6 : i32
    %424 = arith.index_cast %c6_i32 : i32 to index
    %c0_117 = arith.constant 0 : index
    %c0_118 = arith.constant 0 : index
    %425 = vector.load %arg10[%424, %c0_117, %c0_118] : memref<8x8x128xf32, #tpu.memory_space<vmem>>, vector<1x8x128xf32>
    %426 = vector.shape_cast %425 : vector<1x8x128xf32> to vector<8x128xf32>
    %cst_119 = arith.constant dense<0.000000e+00> : vector<8x128xf32>
    %427 = tpu.matmul %386, %3, %cst_119 {dimension_numbers = #tpu.dot_dimension_numbers<[1], [0], [0], [1], [0, 0, 1, 1], [], []>} : vector<8x32xf32>, vector<32x128xf32>, vector<8x128xf32> -> vector<8x128xf32>
    %428 = arith.addf %426, %427 : vector<8x128xf32>
    %429 = vector.extract_strided_slice %428 {offsets = [0, 0], sizes = [8, 32], strides = [1, 1]} : vector<8x128xf32> to vector<8x32xf32>
    %430 = arith.negf %429 : vector<8x32xf32>
    %431 = math.exp %430 : vector<8x32xf32>
    %cst_120 = arith.constant 1.000000e+00 : f32
    %432 = vector.broadcast %cst_120 : f32 to vector<8x32xf32>
    %433 = arith.addf %432, %431 : vector<8x32xf32>
    %434 = arith.divf %432, %433 : vector<8x32xf32>
    %435 = vector.extract_strided_slice %428 {offsets = [0, 32], sizes = [8, 32], strides = [1, 1]} : vector<8x128xf32> to vector<8x32xf32>
    %436 = arith.negf %435 : vector<8x32xf32>
    %437 = math.exp %436 : vector<8x32xf32>
    %cst_121 = arith.constant 1.000000e+00 : f32
    %438 = vector.broadcast %cst_121 : f32 to vector<8x32xf32>
    %439 = arith.addf %438, %437 : vector<8x32xf32>
    %440 = arith.divf %438, %439 : vector<8x32xf32>
    %441 = vector.extract_strided_slice %428 {offsets = [0, 64], sizes = [8, 32], strides = [1, 1]} : vector<8x128xf32> to vector<8x32xf32>
    %442 = math.tanh %441 : vector<8x32xf32>
    %443 = vector.extract_strided_slice %428 {offsets = [0, 96], sizes = [8, 32], strides = [1, 1]} : vector<8x128xf32> to vector<8x32xf32>
    %444 = arith.negf %443 : vector<8x32xf32>
    %445 = math.exp %444 : vector<8x32xf32>
    %cst_122 = arith.constant 1.000000e+00 : f32
    %446 = vector.broadcast %cst_122 : f32 to vector<8x32xf32>
    %447 = arith.addf %446, %445 : vector<8x32xf32>
    %448 = arith.divf %446, %447 : vector<8x32xf32>
    %449 = arith.mulf %440, %384 : vector<8x32xf32>
    %450 = arith.mulf %434, %442 : vector<8x32xf32>
    %451 = arith.addf %449, %450 : vector<8x32xf32>
    %452 = math.tanh %451 : vector<8x32xf32>
    %453 = arith.mulf %448, %452 : vector<8x32xf32>
    %cst_123 = arith.constant dense<0.000000e+00> : vector<8x128xf32>
    %454 = tpu.matmul %453, %4, %cst_123 {dimension_numbers = #tpu.dot_dimension_numbers<[1], [0], [0], [1], [0, 0, 1, 1], [], []>} : vector<8x32xf32>, vector<32x128xf32>, vector<8x128xf32> -> vector<8x128xf32>
    %cst_124 = arith.constant dense<0.000000e+00> : vector<8x128xf32>
    %455 = tpu.matmul %415, %5, %cst_124 {dimension_numbers = #tpu.dot_dimension_numbers<[1], [0], [0], [1], [0, 0, 1, 1], [], []>} : vector<8x32xf32>, vector<32x128xf32>, vector<8x128xf32> -> vector<8x128xf32>
    %456 = arith.addf %454, %455 : vector<8x128xf32>
    %457 = arith.addf %456, %8 : vector<8x128xf32>
    %458 = vector.extract_strided_slice %457 {offsets = [0, 0], sizes = [8, 32], strides = [1, 1]} : vector<8x128xf32> to vector<8x32xf32>
    %459 = arith.negf %458 : vector<8x32xf32>
    %460 = math.exp %459 : vector<8x32xf32>
    %cst_125 = arith.constant 1.000000e+00 : f32
    %461 = vector.broadcast %cst_125 : f32 to vector<8x32xf32>
    %462 = arith.addf %461, %460 : vector<8x32xf32>
    %463 = arith.divf %461, %462 : vector<8x32xf32>
    %464 = vector.extract_strided_slice %457 {offsets = [0, 32], sizes = [8, 32], strides = [1, 1]} : vector<8x128xf32> to vector<8x32xf32>
    %465 = arith.negf %464 : vector<8x32xf32>
    %466 = math.exp %465 : vector<8x32xf32>
    %cst_126 = arith.constant 1.000000e+00 : f32
    %467 = vector.broadcast %cst_126 : f32 to vector<8x32xf32>
    %468 = arith.addf %467, %466 : vector<8x32xf32>
    %469 = arith.divf %467, %468 : vector<8x32xf32>
    %470 = vector.extract_strided_slice %457 {offsets = [0, 64], sizes = [8, 32], strides = [1, 1]} : vector<8x128xf32> to vector<8x32xf32>
    %471 = math.tanh %470 : vector<8x32xf32>
    %472 = vector.extract_strided_slice %457 {offsets = [0, 96], sizes = [8, 32], strides = [1, 1]} : vector<8x128xf32> to vector<8x32xf32>
    %473 = arith.negf %472 : vector<8x32xf32>
    %474 = math.exp %473 : vector<8x32xf32>
    %cst_127 = arith.constant 1.000000e+00 : f32
    %475 = vector.broadcast %cst_127 : f32 to vector<8x32xf32>
    %476 = arith.addf %475, %474 : vector<8x32xf32>
    %477 = arith.divf %475, %476 : vector<8x32xf32>
    %478 = arith.mulf %469, %413 : vector<8x32xf32>
    %479 = arith.mulf %463, %471 : vector<8x32xf32>
    %480 = arith.addf %478, %479 : vector<8x32xf32>
    %481 = math.tanh %480 : vector<8x32xf32>
    %482 = arith.mulf %477, %481 : vector<8x32xf32>
    %483 = arith.index_cast %c6_i32 : i32 to index
    %c0_128 = arith.constant 0 : index
    %c0_129 = arith.constant 0 : index
    %484 = vector.load %arg8[%483, %c0_128, %c0_129] : memref<8x8x32xf32, #tpu.memory_space<vmem>>, vector<1x8x32xf32>
    %485 = vector.shape_cast %484 : vector<1x8x32xf32> to vector<8x32xf32>
    %486 = vector.shape_cast %453 : vector<8x32xf32> to vector<1x8x32xf32>
    tpu.vector_store %arg8[%483, %c0_128, %c0_129], %486 {strides = array<i32>} : memref<8x8x32xf32, #tpu.memory_space<vmem>>, vector<1x8x32xf32>,
    %487 = arith.index_cast %c6_i32 : i32 to index
    %c0_130 = arith.constant 0 : index
    %c0_131 = arith.constant 0 : index
    %488 = vector.load %arg9[%487, %c0_130, %c0_131] : memref<8x8x32xf32, #tpu.memory_space<vmem>>, vector<1x8x32xf32>
    %489 = vector.shape_cast %488 : vector<1x8x32xf32> to vector<8x32xf32>
    %490 = vector.shape_cast %482 : vector<8x32xf32> to vector<1x8x32xf32>
    tpu.vector_store %arg9[%487, %c0_130, %c0_131], %490 {strides = array<i32>} : memref<8x8x32xf32, #tpu.memory_space<vmem>>, vector<1x8x32xf32>,
    %c7_i32 = arith.constant 7 : i32
    %491 = arith.index_cast %c7_i32 : i32 to index
    %c0_132 = arith.constant 0 : index
    %c0_133 = arith.constant 0 : index
    %492 = vector.load %arg10[%491, %c0_132, %c0_133] : memref<8x8x128xf32, #tpu.memory_space<vmem>>, vector<1x8x128xf32>
    %493 = vector.shape_cast %492 : vector<1x8x128xf32> to vector<8x128xf32>
    %cst_134 = arith.constant dense<0.000000e+00> : vector<8x128xf32>
    %494 = tpu.matmul %453, %3, %cst_134 {dimension_numbers = #tpu.dot_dimension_numbers<[1], [0], [0], [1], [0, 0, 1, 1], [], []>} : vector<8x32xf32>, vector<32x128xf32>, vector<8x128xf32> -> vector<8x128xf32>
    %495 = arith.addf %493, %494 : vector<8x128xf32>
    %496 = vector.extract_strided_slice %495 {offsets = [0, 0], sizes = [8, 32], strides = [1, 1]} : vector<8x128xf32> to vector<8x32xf32>
    %497 = arith.negf %496 : vector<8x32xf32>
    %498 = math.exp %497 : vector<8x32xf32>
    %cst_135 = arith.constant 1.000000e+00 : f32
    %499 = vector.broadcast %cst_135 : f32 to vector<8x32xf32>
    %500 = arith.addf %499, %498 : vector<8x32xf32>
    %501 = arith.divf %499, %500 : vector<8x32xf32>
    %502 = vector.extract_strided_slice %495 {offsets = [0, 32], sizes = [8, 32], strides = [1, 1]} : vector<8x128xf32> to vector<8x32xf32>
    %503 = arith.negf %502 : vector<8x32xf32>
    %504 = math.exp %503 : vector<8x32xf32>
    %cst_136 = arith.constant 1.000000e+00 : f32
    %505 = vector.broadcast %cst_136 : f32 to vector<8x32xf32>
    %506 = arith.addf %505, %504 : vector<8x32xf32>
    %507 = arith.divf %505, %506 : vector<8x32xf32>
    %508 = vector.extract_strided_slice %495 {offsets = [0, 64], sizes = [8, 32], strides = [1, 1]} : vector<8x128xf32> to vector<8x32xf32>
    %509 = math.tanh %508 : vector<8x32xf32>
    %510 = vector.extract_strided_slice %495 {offsets = [0, 96], sizes = [8, 32], strides = [1, 1]} : vector<8x128xf32> to vector<8x32xf32>
    %511 = arith.negf %510 : vector<8x32xf32>
    %512 = math.exp %511 : vector<8x32xf32>
    %cst_137 = arith.constant 1.000000e+00 : f32
    %513 = vector.broadcast %cst_137 : f32 to vector<8x32xf32>
    %514 = arith.addf %513, %512 : vector<8x32xf32>
    %515 = arith.divf %513, %514 : vector<8x32xf32>
    %516 = arith.mulf %507, %451 : vector<8x32xf32>
    %517 = arith.mulf %501, %509 : vector<8x32xf32>
    %518 = arith.addf %516, %517 : vector<8x32xf32>
    %519 = math.tanh %518 : vector<8x32xf32>
    %520 = arith.mulf %515, %519 : vector<8x32xf32>
    %cst_138 = arith.constant dense<0.000000e+00> : vector<8x128xf32>
    %521 = tpu.matmul %520, %4, %cst_138 {dimension_numbers = #tpu.dot_dimension_numbers<[1], [0], [0], [1], [0, 0, 1, 1], [], []>} : vector<8x32xf32>, vector<32x128xf32>, vector<8x128xf32> -> vector<8x128xf32>
    %cst_139 = arith.constant dense<0.000000e+00> : vector<8x128xf32>
    %522 = tpu.matmul %482, %5, %cst_139 {dimension_numbers = #tpu.dot_dimension_numbers<[1], [0], [0], [1], [0, 0, 1, 1], [], []>} : vector<8x32xf32>, vector<32x128xf32>, vector<8x128xf32> -> vector<8x128xf32>
    %523 = arith.addf %521, %522 : vector<8x128xf32>
    %524 = arith.addf %523, %8 : vector<8x128xf32>
    %525 = vector.extract_strided_slice %524 {offsets = [0, 0], sizes = [8, 32], strides = [1, 1]} : vector<8x128xf32> to vector<8x32xf32>
    %526 = arith.negf %525 : vector<8x32xf32>
    %527 = math.exp %526 : vector<8x32xf32>
    %cst_140 = arith.constant 1.000000e+00 : f32
    %528 = vector.broadcast %cst_140 : f32 to vector<8x32xf32>
    %529 = arith.addf %528, %527 : vector<8x32xf32>
    %530 = arith.divf %528, %529 : vector<8x32xf32>
    %531 = vector.extract_strided_slice %524 {offsets = [0, 32], sizes = [8, 32], strides = [1, 1]} : vector<8x128xf32> to vector<8x32xf32>
    %532 = arith.negf %531 : vector<8x32xf32>
    %533 = math.exp %532 : vector<8x32xf32>
    %cst_141 = arith.constant 1.000000e+00 : f32
    %534 = vector.broadcast %cst_141 : f32 to vector<8x32xf32>
    %535 = arith.addf %534, %533 : vector<8x32xf32>
    %536 = arith.divf %534, %535 : vector<8x32xf32>
    %537 = vector.extract_strided_slice %524 {offsets = [0, 64], sizes = [8, 32], strides = [1, 1]} : vector<8x128xf32> to vector<8x32xf32>
    %538 = math.tanh %537 : vector<8x32xf32>
    %539 = vector.extract_strided_slice %524 {offsets = [0, 96], sizes = [8, 32], strides = [1, 1]} : vector<8x128xf32> to vector<8x32xf32>
    %540 = arith.negf %539 : vector<8x32xf32>
    %541 = math.exp %540 : vector<8x32xf32>
    %cst_142 = arith.constant 1.000000e+00 : f32
    %542 = vector.broadcast %cst_142 : f32 to vector<8x32xf32>
    %543 = arith.addf %542, %541 : vector<8x32xf32>
    %544 = arith.divf %542, %543 : vector<8x32xf32>
    %545 = arith.mulf %536, %480 : vector<8x32xf32>
    %546 = arith.mulf %530, %538 : vector<8x32xf32>
    %547 = arith.addf %545, %546 : vector<8x32xf32>
    %548 = math.tanh %547 : vector<8x32xf32>
    %549 = arith.mulf %544, %548 : vector<8x32xf32>
    %550 = arith.index_cast %c7_i32 : i32 to index
    %c0_143 = arith.constant 0 : index
    %c0_144 = arith.constant 0 : index
    %551 = vector.load %arg8[%550, %c0_143, %c0_144] : memref<8x8x32xf32, #tpu.memory_space<vmem>>, vector<1x8x32xf32>
    %552 = vector.shape_cast %551 : vector<1x8x32xf32> to vector<8x32xf32>
    %553 = vector.shape_cast %520 : vector<8x32xf32> to vector<1x8x32xf32>
    tpu.vector_store %arg8[%550, %c0_143, %c0_144], %553 {strides = array<i32>} : memref<8x8x32xf32, #tpu.memory_space<vmem>>, vector<1x8x32xf32>,
    %554 = arith.index_cast %c7_i32 : i32 to index
    %c0_145 = arith.constant 0 : index
    %c0_146 = arith.constant 0 : index
    %555 = vector.load %arg9[%554, %c0_145, %c0_146] : memref<8x8x32xf32, #tpu.memory_space<vmem>>, vector<1x8x32xf32>
    %556 = vector.shape_cast %555 : vector<1x8x32xf32> to vector<8x32xf32>
    %557 = vector.shape_cast %549 : vector<8x32xf32> to vector<1x8x32xf32>
    tpu.vector_store %arg9[%554, %c0_145, %c0_146], %557 {strides = array<i32>} : memref<8x8x32xf32, #tpu.memory_space<vmem>>, vector<1x8x32xf32>,
    %c8_i32 = arith.constant 8 : i32
    %c0_147 = arith.constant 0 : index
    %c0_148 = arith.constant 0 : index
    %558 = vector.load %arg11[%c0_147, %c0_148] : memref<8x32xf32, #tpu.memory_space<vmem>>, vector<8x32xf32>
    tpu.vector_store %arg11[%c0_147, %c0_148], %520 {strides = array<i32>} : memref<8x32xf32, #tpu.memory_space<vmem>>, vector<8x32xf32>,
    %c0_149 = arith.constant 0 : index
    %c0_150 = arith.constant 0 : index
    %559 = vector.load %arg12[%c0_149, %c0_150] : memref<8x32xf32, #tpu.memory_space<vmem>>, vector<8x32xf32>
    tpu.vector_store %arg12[%c0_149, %c0_150], %518 {strides = array<i32>} : memref<8x32xf32, #tpu.memory_space<vmem>>, vector<8x32xf32>,
    %c0_151 = arith.constant 0 : index
    %c0_152 = arith.constant 0 : index
    %560 = vector.load %arg13[%c0_151, %c0_152] : memref<8x32xf32, #tpu.memory_space<vmem>>, vector<8x32xf32>
    tpu.vector_store %arg13[%c0_151, %c0_152], %549 {strides = array<i32>} : memref<8x32xf32, #tpu.memory_space<vmem>>, vector<8x32xf32>,
    %c0_153 = arith.constant 0 : index
    %c0_154 = arith.constant 0 : index
    %561 = vector.load %arg14[%c0_153, %c0_154] : memref<8x32xf32, #tpu.memory_space<vmem>>, vector<8x32xf32>
    tpu.vector_store %arg14[%c0_153, %c0_154], %547 {strides = array<i32>} : memref<8x32xf32, #tpu.memory_space<vmem>>, vector<8x32xf32>,
    return
  }
  func.func @transform_0(%arg0: i32) -> (i32, i32, i32) {
    %c0_i32 = arith.constant 0 : i32
    %c0_i32_0 = arith.constant 0 : i32
    %c0_i32_1 = arith.constant 0 : i32
    return %arg0, %c0_i32, %c0_i32_0 : i32, i32, i32
  }
  func.func @transform_1(%arg0: i32) -> (i32, i32) {
    %c0_i32 = arith.constant 0 : i32
    %c0_i32_0 = arith.constant 0 : i32
    %c0_i32_1 = arith.constant 0 : i32
    return %c0_i32, %c0_i32_0 : i32, i32
  }
  func.func @transform_2(%arg0: i32) -> (i32, i32) {
    %c0_i32 = arith.constant 0 : i32
    %c0_i32_0 = arith.constant 0 : i32
    %c0_i32_1 = arith.constant 0 : i32
    return %c0_i32, %c0_i32_0 : i32, i32
  }
  func.func @transform_3(%arg0: i32) -> (i32, i32) {
    %c0_i32 = arith.constant 0 : i32
    %c0_i32_0 = arith.constant 0 : i32
    %c0_i32_1 = arith.constant 0 : i32
    return %c0_i32, %c0_i32_0 : i32, i32
  }
  func.func @transform_4(%arg0: i32) -> (i32, i32) {
    %c0_i32 = arith.constant 0 : i32
    %c0_i32_0 = arith.constant 0 : i32
    %c0_i32_1 = arith.constant 0 : i32
    return %c0_i32, %c0_i32_0 : i32, i32
  }
  func.func @transform_5(%arg0: i32) -> (i32, i32) {
    %c0_i32 = arith.constant 0 : i32
    %c0_i32_0 = arith.constant 0 : i32
    %c0_i32_1 = arith.constant 0 : i32
    return %c0_i32, %c0_i32_0 : i32, i32
  }
  func.func @transform_6(%arg0: i32) -> (i32, i32) {
    %c0_i32 = arith.constant 0 : i32
    %c0_i32_0 = arith.constant 0 : i32
    %c0_i32_1 = arith.constant 0 : i32
    return %c0_i32, %c0_i32_0 : i32, i32
  }
  func.func @transform_7(%arg0: i32) -> (i32, i32, i32) {
    %c0_i32 = arith.constant 0 : i32
    %c0_i32_0 = arith.constant 0 : i32
    %c0_i32_1 = arith.constant 0 : i32
    return %arg0, %c0_i32, %c0_i32_0 : i32, i32, i32
  }
  func.func @transform_8(%arg0: i32) -> (i32, i32, i32) {
    %c0_i32 = arith.constant 0 : i32
    %c0_i32_0 = arith.constant 0 : i32
    %c0_i32_1 = arith.constant 0 : i32
    return %arg0, %c0_i32, %c0_i32_0 : i32, i32, i32
  }
}

</mosaic_0001>

<bundles_post_ra>
// kernel: tpu_custom_call.1
= control target key start
LH: loop header
LB: loop body
LE: loop exit
PB: predicated region body
PF: predicated region fallthrough
CT: control target
= control target key end

     0   :  { %14 = vsyncpa [#allocation8], 0  ;;  %s4055_s0 = inlined_call_operand.hbm [shape: f32[8,8,32], index: 0, kind: input, shape index: {}]   ;;  %s4056_s1 = inlined_call_operand.hbm [shape: f32[32,128], index: 1, kind: input, shape index: {}]   ;;  %s4057_s2 = inlined_call_operand.hbm [shape: f32[32,128], index: 2, kind: input, shape index: {}]   ;;  %s4058_s3 = inlined_call_operand.vmem [shape: f32[1,128], index: 3, kind: input, shape index: {}]   ;;  %s4059_s4 = inlined_call_operand.hbm [shape: f32[32,128], index: 4, kind: input, shape index: {}]   ;;  %s4060_s5 = inlined_call_operand.hbm [shape: f32[32,128], index: 5, kind: input, shape index: {}]   ;;  %s4061_s6 = inlined_call_operand.vmem [shape: f32[1,128], index: 6, kind: input, shape index: {}]   ;;  %s4062_s7 = inlined_call_operand.hbm [shape: f32[8,8,32], index: 7, kind: output, shape index: {0}]   ;;  %s4063_s8 = inlined_call_operand.hbm [shape: f32[8,8,32], index: 8, kind: output, shape index: {1}]  }
   0x1   :  { %15 = vsyncpa [#allocation11], 0 }
   0x2   :  { %16 = vsyncpa [#allocation14], 0 }
   0x3   :  { %17 = vsyncpa [#allocation9], 0 }
   0x4   :  { %18 = vsyncpa [#allocation18], 0  ;;  %s3493_s27 = smov [#allocation10]   ;;  %s3494_s29 = smov [#allocation13]  }
   0x5   :  { %s36_s28 = sshll.u32 %s3493_s27, 4  ;;  %s62_s30 = sshll.u32 %s3494_s29, 4  ;;  %s37_s28 = int_to_ptr.vmem [resolvable:$true] %s36_s28  ;;  %s3553_s30 = int_to_ptr.vmem [resolvable:$true] %s62_s30 }
   0x6   :  { %s3329_s11 = scalar_lea.hbm %s4056_s1, 512 }
   0x7   :  { %p3330_p0 = scmp.ne.s32.totalorder %s4056_s1, %s3329_s11  ;;  %p3333_p1 = scmp.lt.u32.totalorder %s3329_s11, %s4056_s1 }
   0x9   :  { %p3335_p2 = pnand %p3333_p1, %p3330_p0 }
   0xb   :  { %3338 = shalt.err (!%p3335_p2)
}
   0xc   :  { %s3339_s16 = scalar_lea.vmem %s37_s28, 512  ;;  %p3344_p4 = scmp.lt.s32.totalorder %s37_s28, %s37_s28 }
   0xd   :  { %p3340_p3 = scmp.ne.s32.totalorder %s37_s28, %s3339_s16  ;;  %p3345_p5 = scmp.lt.s32.totalorder %s3339_s16, %s3339_s16 }
   0xf   :  { %p3346_p6 = por %p3345_p5, %p3344_p4 }
  0x11   :  { %p3347_p7 = pnand %p3346_p6, %p3340_p3 }
  0x13   :  { %3350 = shalt.err (!%p3347_p7)
}
  0x14   :  { %s3495_s17 = smov 128   ;;  %s3496_s18 = smov 8  }
  0x15   :  { %42 = dma.hbm_to_vmem [thread:$0]  %s4056_s1, 512, %s37_s28, [#allocation11], %s3495_s17, %s3495_s17, %s3496_s18  }
  0x16   :  { %s3351_s23 = scalar_lea.hbm %s4059_s4, 512 }
  0x17   :  { %p3352_p8 = scmp.ne.s32.totalorder %s4059_s4, %s3351_s23  ;;  %p3355_p9 = scmp.lt.u32.totalorder %s3351_s23, %s4059_s4 }
  0x19   :  { %p3357_p10 = pnand %p3355_p9, %p3352_p8 }
  0x1b   :  { %3360 = shalt.err (!%p3357_p10)
}
  0x1c   :  { %s3361_s29 = scalar_lea.vmem %s3553_s30, 512  ;;  %p3366_p12 = scmp.lt.s32.totalorder %s3553_s30, %s3553_s30 }
  0x1d   :  { %p3362_p11 = scmp.ne.s32.totalorder %s3553_s30, %s3361_s29  ;;  %p3367_p13 = scmp.lt.s32.totalorder %s3361_s29, %s3361_s29 }
  0x1f   :  { %p3368_p0 = por %p3367_p13, %p3366_p12 }
  0x21   :  { %p3369_p1 = pnand %p3368_p0, %p3362_p11 }
  0x23   :  { %3372 = shalt.err (!%p3369_p1)
}
  0x24   :  { %68 = dma.hbm_to_vmem [thread:$0]  %s4059_s4, 512, %s3553_s30, [#allocation14], %s3495_s17, %s3495_s17, %s3496_s18  }
  0x25   :  { %s3497_s9 = smov [#allocation7]   ;;  %s3498_s11 = smov [#allocation12]  }
  0x26   :  { %s24_s10 = sshll.u32 %s3497_s9, 4  ;;  %s48_s12 = sshll.u32 %s3498_s11, 4  ;;  %s25_s10 = int_to_ptr.vmem [resolvable:$true] %s24_s10  ;;  %s3590_s12 = int_to_ptr.vmem [resolvable:$true] %s48_s12 }
  0x27   :  { %s3373_s15 = scalar_lea.hbm %s4055_s0, 1024 }
  0x28   :  { %p3374_p2 = scmp.ne.s32.totalorder %s4055_s0, %s3373_s15  ;;  %p3377_p3 = scmp.lt.u32.totalorder %s3373_s15, %s4055_s0 }
  0x2a   :  { %p3379_p4 = pnand %p3377_p3, %p3374_p2 }
  0x2c   :  { %3382 = shalt.err (!%p3379_p4)
}
  0x2d   :  { %s3383_s4 = scalar_lea.vmem %s25_s10, 1024  ;;  %p3388_p6 = scmp.lt.s32.totalorder %s25_s10, %s25_s10 }
  0x2e   :  { %p3384_p5 = scmp.ne.s32.totalorder %s25_s10, %s3383_s4  ;;  %p3389_p7 = scmp.lt.s32.totalorder %s3383_s4, %s3383_s4 }
  0x30   :  { %p3390_p8 = por %p3389_p7, %p3388_p6 }
  0x32   :  { %p3391_p9 = pnand %p3390_p8, %p3384_p5 }
  0x34   :  { %3394 = shalt.err (!%p3391_p9)
}
  0x35   :  { %30 = dma.hbm_to_vmem [thread:$0]  %s4055_s0, 1024, %s25_s10, [#allocation8], %s3495_s17, %s3495_s17, %s3496_s18  }
  0x36   :  { %s3395_s25 = scalar_lea.hbm %s4057_s2, 512 }
  0x37   :  { %p3396_p10 = scmp.ne.s32.totalorder %s4057_s2, %s3395_s25  ;;  %p3399_p11 = scmp.lt.u32.totalorder %s3395_s25, %s4057_s2 }
  0x39   :  { %p3401_p12 = pnand %p3399_p11, %p3396_p10 }
  0x3b   :  { %3404 = shalt.err (!%p3401_p12)
}
  0x3c   :  { %s3405_s28 = scalar_lea.vmem %s3590_s12, 512  ;;  %p3410_p0 = scmp.lt.s32.totalorder %s3590_s12, %s3590_s12 }
  0x3d   :  { %p3406_p13 = scmp.ne.s32.totalorder %s3590_s12, %s3405_s28  ;;  %p3411_p1 = scmp.lt.s32.totalorder %s3405_s28, %s3405_s28 }
  0x3f   :  { %p3412_p2 = por %p3411_p1, %p3410_p0 }
  0x41   :  { %p3413_p3 = pnand %p3412_p2, %p3406_p13 }
  0x43   :  { %3416 = shalt.err (!%p3413_p3)
}
  0x44   :  { %54 = dma.hbm_to_vmem [thread:$0]  %s4057_s2, 512, %s3590_s12, [#allocation11], %s3495_s17, %s3495_s17, %s3496_s18  }
  0x45   :  { %s3499_s10 = smov [#allocation15]   ;;  %s3417_s15 = scalar_lea.hbm %s4060_s5, 512 }
  0x46   :  { %s74_s11 = sshll.u32 %s3499_s10, 4  ;;  %p3418_p4 = scmp.ne.s32.totalorder %s4060_s5, %s3417_s15  ;;  %s75_s11 = int_to_ptr.vmem [resolvable:$true] %s74_s11 }
  0x47   :  { %p3421_p5 = scmp.lt.u32.totalorder %s3417_s15, %s4060_s5 }
  0x49   :  { %p3423_p6 = pnand %p3421_p5, %p3418_p4 }
  0x4b   :  { %3426 = shalt.err (!%p3423_p6)
}
  0x4c   :  { %s3427_s4 = scalar_lea.vmem %s75_s11, 512  ;;  %p3432_p8 = scmp.lt.s32.totalorder %s75_s11, %s75_s11 }
  0x4d   :  { %p3428_p7 = scmp.ne.s32.totalorder %s75_s11, %s3427_s4  ;;  %p3433_p9 = scmp.lt.s32.totalorder %s3427_s4, %s3427_s4 }
  0x4f   :  { %p3434_p10 = por %p3433_p9, %p3432_p8 }
  0x51   :  { %p3435_p11 = pnand %p3434_p10, %p3428_p7 }
  0x53   :  { %3438 = shalt.err (!%p3435_p11)
}
  0x54   :  { %80 = dma.hbm_to_vmem [thread:$0]  %s4060_s5, 512, %s75_s11, [#allocation14], %s3495_s17, %s3495_s17, %s3496_s18  }
  0x55   :  { %3483 = dma.done.wait [#allocation8], 1024  }
  0x56   :  { %3484 = vsyncadd [#allocation8], 4294966272 }
  0x57   :  { %3485 = dma.done.wait [#allocation11], 1024  }
  0x58   :  { %3486 = vsyncadd [#allocation11], 4294966272 }
  0x59   :  { %3487 = dma.done.wait [#allocation14], 1024  }
  0x5a   :  { %3488 = vsyncadd [#allocation14], 4294966272  ;;  %vm102_vm0 = vcmask 261120   ;;  %v3500_v0 = vmov 0.0|0.0   ;;  %vm3501_vm1 = vmmov 0   ;;  %v3502_v1 = vmov 0.0  }
  0x5b   :  { %3041 = vmatprep.subr.bf16.mxu1 %v3500_v0  ;;  %2777 = vmatprep.mubr.msk.f32.mxu1 %vm3501_vm1, %v3502_v1  ;;  %103 = vst.msk [vmem:[#allocation3] sm:$0xff] %vm102_vm0, %v3502_v1  ;;  %104 = vst.msk [vmem:[#allocation4] sm:$0xff] %vm102_vm0, %v3502_v1  ;;  %v134_v2 = vld [vmem:[#allocation10] sm:$0xff]  ;;  %v135_v3 = vld [vmem:[#allocation10 + $0x8] sm:$0xff]  ;;  %s3503_s22 = smov 64   ;;  %s3504_s23 = smov 32  }
  0x5c   :  { %105 = vst.msk [vmem:[#allocation5] sm:$0xff] %vm102_vm0, %v3502_v1  ;;  %106 = vst.msk [vmem:[#allocation6] sm:$0xff] %vm102_vm0, %v3502_v1  ;;  %v107_v4 = vld [vmem:[#allocation12] sm:$0xff]  ;;  %v3033_v5 = vpack.c.bf16 %v135_v3, %v134_v2  ;;  %v108_v6 = vld [vmem:[#allocation12 + $0x8] sm:$0xff]  ;;  %s3506_s27 = smov [#allocation16]  }
  0x5d   :  { %v136_v7 = vld [vmem:[#allocation10 + $0x10] sm:$0xff]  ;;  %v137_v8 = vld [vmem:[#allocation10 + $0x18] sm:$0xff]  ;;  %v3653_v9 = vpack.c.bf16 %v108_v6, %v107_v4  ;;  %v126_v11 = vld [vmem:[#allocation7] sm:$0xff]  ;;  %s2537_s29 = sshll.u32 %s3506_s27, 4  ;;  %s2538_s29 = int_to_ptr.vmem [resolvable:$true] %s2537_s29 }
  0x5e   :  { %v3037_v10 = vpack.c.bf16 %v137_v8, %v136_v7  ;;  %v109_v12 = vld [vmem:[#allocation12 + $0x10] sm:$0xff]  ;;  %v110_v13 = vld [vmem:[#allocation12 + $0x18] sm:$0xff]  ;;  %3034 = vmatprep.subr.bf16.mxu0 %v3033_v5  ;;  %2757 = vmatprep.mubr.msk.f32.mxu0 %vm102_vm0, %v126_v11  ;;  %v127_v15 = vld [vmem:[#allocation7 + $0x8] sm:$0xff]  ;;  %s3439_s1 = scalar_lea.vmem %s2538_s29, 1024  ;;  %p3444_p13 = scmp.lt.s32.totalorder %s2538_s29, %s2538_s29 }
  0x5f   :  { %3036 = vmatpush3.bf16.msra.mxu0 %v3033_v5  ;;  %3043 = vmatpush3.bf16.msra.mxu1 %v3653_v9  ;;  %v3657_v14 = vpack.c.bf16 %v110_v13, %v109_v12  ;;  %v3670_v17 = vld [vmem:[%s4058_s3] ss:$0 sm:$0xff]  ;;  %v112_v37 = vld [vmem:[#allocation13 + $0x8] sm:$0xff]  ;;  %v128_v41 = vld [vmem:[#allocation7 + $0x10] sm:$0xff]  ;;  %p3440_p12 = scmp.ne.s32.totalorder %s2538_s29, %s3439_s1  ;;  %p3445_p0 = scmp.lt.s32.totalorder %s3439_s1, %s3439_s1 }
  0x60   :  { %3038 = vmatprep.subr.bf16.mxu0 %v3037_v10  ;;  %3044 = vmatprep.subr.bf16.mxu1 %v3500_v0  ;;  %v111_v36 = vld [vmem:[#allocation13] sm:$0xff]  ;;  %v116_v40 = vld [vmem:[#allocation15 + $0x8] sm:$0xff]  ;;  %v129_v42 = vld [vmem:[#allocation7 + $0x18] sm:$0xff] }
  0x61   :  { %v115_v38 = vld [vmem:[#allocation15] sm:$0xff]  ;;  %v3681_v39 = vpack.c.bf16 %v112_v37, %v111_v36  ;;  %v117_v44 = vld [vmem:[#allocation15 + $0x10] sm:$0xff]  ;;  %v118_v45 = vld [vmem:[#allocation15 + $0x18] sm:$0xff]  ;;  %p3446_p1 = por %p3445_p0, %p3444_p13 }
  0x62   :  { %v283_v16 = vld [vmem:[#allocation3] sm:$0xff]  ;;  %v284_v25 = vld [vmem:[#allocation4] sm:$0xff]  ;;  %v3683_v43 = vpack.c.bf16 %v116_v40, %v115_v38  ;;  %v113_v47 = vld [vmem:[#allocation13 + $0x10] sm:$0xff]  ;;  %v3689_v49 = vpack.c.bf16 %v118_v45, %v117_v44 }
  0x63   :  { %3040 = vmatpush3.bf16.msra.mxu0 %v3037_v10  ;;  %3046 = vmatpush3.bf16.msra.mxu1 %v3657_v14  ;;  %v130_v46 = vld [vmem:[#allocation7 + $0x20] sm:$0xff]  ;;  %v114_v48 = vld [vmem:[#allocation13 + $0x18] sm:$0xff]  ;;  %v131_v51 = vld [vmem:[#allocation7 + $0x28] sm:$0xff]  ;;  %p3447_p2 = pnand %p3446_p1, %p3440_p12 }
  0x64   :  { %3053 = vmatprep.subr.bf16.mxu0 %v3500_v0  ;;  %3047 = vmatprep.subr.bf16.mxu1 %v3500_v0  ;;  %v3691_v50 = vpack.c.bf16 %v114_v48, %v113_v47  ;;  %v132_v52 = vld [vmem:[#allocation7 + $0x30] sm:$0xff]  ;;  %v133_v54 = vld [vmem:[#allocation7 + $0x38] sm:$0xff]  ;;  %v3746_v6 = vld [vmem:[%s4061_s6] ss:$0 sm:$0xff] }
  0x65   :  { %v285_v53 = vld [vmem:[#allocation5] sm:$0xff] }
  0x66   :  { %2758 = vmatmul.mubr.msk.f32.vlgmr.msra.gmra.mrb[0].mxu0 %vm102_vm0, %v127_v15  ;;  %2778 = vmatmul.mubr.msk.f32.vlgmr.msra.gmra.mrb[0].mxu1 %vm102_vm0, %v283_v16 }
  0x67   :  { %2788 = vmatprep.mubr.msk.f32.mxu1 %vm3501_vm1, %v3502_v1  ;;  %2760 = vmatprep.mubr.msk.f32.mxu0 %vm102_vm0, %v128_v41 }
  0x68   :  { %3055 = vmatpush3.bf16.msra.mxu0 %v3681_v39  ;;  %3049 = vmatpush3.bf16.msra.mxu1 %v3683_v43 }
  0x69   :  { %3050 = vmatprep.subr.bf16.mxu1 %v3500_v0  ;;  %3056 = vmatprep.subr.bf16.mxu0 %v3500_v0 }
  0x6a   :  { %2761 = vmatmul.mubr.msk.f32.gmra.mrb[2].mxu0 %vm102_vm0, %v129_v42 }
  0x6b   :  { %2763 = vmatprep.mubr.msk.f32.mxu0 %vm102_vm0, %v130_v46 }
  0x6c   :  { %3058 = vmatpush3.bf16.msra.mxu0 %v3691_v50  ;;  %3052 = vmatpush3.bf16.msra.mxu1 %v3689_v49 }
  0x6d   :  { %3059 = vmatprep.subr.bf16.mxu1 %v3500_v0  ;;  %3065 = vmatprep.subr.bf16.mxu0 %v3500_v0 }
  0x6e   :  { %2764 = vmatmul.mubr.msk.f32.gmra.mrb[4].mxu0 %vm102_vm0, %v131_v51 }
  0x6f   :  { %2766 = vmatprep.mubr.msk.f32.mxu0 %vm102_vm0, %v132_v52  ;;  %2789 = vmatmul.mubr.msk.f32.vlgmr.msra.gmra.mrb[2].mxu1 %vm102_vm0, %v285_v53 }
  0x70   :  { %3061 = vmatpush3.bf16.msra.mxu1 %v3653_v9  ;;  %2810 = vmatprep.mubr.msk.f32.mxu1 %vm3501_vm1, %v3502_v1 }
  0x71   :  { %3062 = vmatprep.subr.bf16.mxu1 %v3500_v0 }
  0x72   :  { %2767 = vmatmul.mubr.msk.f32.gmra.mrb[6].mxu0 %vm102_vm0, %v133_v54 }
  0x73   :  { %2799 = vmatprep.mubr.msk.f32.mxu0 %vm3501_vm1, %v3502_v1 }
  0x74   :  { %3064 = vmatpush3.bf16.msra.mxu1 %v3657_v14 }
  0x75   :  { %3071 = vmatprep.subr.bf16.mxu1 %v3500_v0 }
 0x139   :  { %v3672_v18 = vpop.f32.mrb[0].mxu0  ;;  %v357_v19 = vpop.f32.mrb[0].mxu1 }
 0x13a   :  { %v236_v20 = vpop.f32.mrb[1].mxu0  ;;  %v2779_v21 = vpop.f32.mrb[1].mxu1  ;;  %v242_v5 = vadd.f32 %v3672_v18, %v3670_v17  ;;  %v286_v18 = vld [vmem:[#allocation6] sm:$0xff] }
 0x13b   :  { %v237_v22 = vadd.f32 %v3670_v17, %v236_v20 }
 0x13d   :  { %v361_v23 = vadd.f32 %v357_v19, %v237_v22  ;;  %v3714_v58 = vpop.f32.mrb[2].mxu0 }
 0x13e   :  { %v3716_v59 = vpop.f32.mrb[3].mxu0 }
 0x13f   :  { %3200 = vtanh.f32 %v361_v23  ;;  %v2578_v26 = vmul.f32 -1.442695, %v361_v23 }
 0x141   :  { %3202 = vpow2.f32 %v2578_v26  ;;  %v3718_v60 = vpop.f32.mrb[4].mxu0 }
 0x142   :  { %v3720_v61 = vpop.f32.mrb[5].mxu0  ;;  %v459_v62 = vpop.f32.mrb[2].mxu1 }
 0x143   :  { %v2790_v2 = vpop.f32.mrb[3].mxu1 }
 0x145   :  { %v3722_v63 = vpop.f32.mrb[6].mxu0 }
 0x146   :  { %v3724_v3 = vpop.f32.mrb[7].mxu0 }
 0x149   :  { %v3201_v24 = vpop.eup %3200 }
 0x14a   :  { %375 = vrot.lane.b32.xlu0 %v3201_v24, %s3503_s22 }
 0x14b   :  { %v3203_v27 = vpop.eup %3202 }
 0x14c   :  { %v365_v28 = vadd.f32 1.0, %v3203_v27 }
 0x14e   :  { %370 = vrot.lane.b32.xlu0 %v284_v25, %s3504_s23  ;;  %3204 = vrcp.f32 %v365_v28 }
 0x158   :  { %v3205_v29 = vpop.eup %3204 }
 0x1bc   :  { %v376_v30 = vpop.permute.xlu0 %375 }
 0x1bd   :  { %v378_v31 = vmul.f32 %v3205_v29, %v376_v30 }
 0x1bf   :  { %380 = vrot.lane.b32.xlu1 %v378_v31, %s3504_s23 }
 0x1c0   :  { %v371_v32 = vpop.permute.xlu0 %370 }
 0x1c1   :  { %v373_v33 = vmul.f32 %v3205_v29, %v371_v32 }
 0x231   :  { %v381_v34 = vpop.permute.xlu1 %380 }
 0x232   :  { %v3678_v35 = vadd.f32 %v381_v34, %v373_v33 }
 0x234   :  { %3206 = vtanh.f32 %v3678_v35 }
 0x23e   :  { %v3207_v55 = vpop.eup %3206 }
 0x23f   :  { %386 = vrot.lane.b32.xlu1 %v3207_v55, %s3503_s22 }
 0x2b1   :  { %v387_v56 = vpop.permute.xlu1 %386 }
 0x2b2   :  { %v389_v57 = vmul.f32 %v3205_v29, %v387_v56 }
 0x2b4   :  { %464 = vrot.lane.b32.xlu0 %v389_v57, %s3504_s23  ;;  %v247_v57 = vadd.f32 %v3670_v17, %v3716_v59 }
 0x326   :  { %v465_v4 = vpop.permute.xlu0 %464 }
 0x327   :  { %568 = vst.msk [vmem:[#allocation16] sm:$0xff] %vm102_vm0, %v465_v4  ;;  %2800 = vmatmul.mubr.msk.f32.vlgmr.msra.gmra.mrb[8].mxu0 %vm102_vm0, %v465_v4  ;;  %2811 = vmatmul.mubr.msk.f32.vlgmr.msra.gmra.mrb[4].mxu1 %vm102_vm0, %v465_v4 }
 0x328   :  { %3073 = vmatpush3.bf16.msra.mxu1 %v3681_v39  ;;  %3067 = vmatpush3.bf16.msra.mxu0 %v3683_v43 }
 0x329   :  { %3074 = vmatprep.subr.bf16.mxu1 %v3500_v0  ;;  %3068 = vmatprep.subr.bf16.mxu0 %v3500_v0 }
 0x32a   :  { %2832 = vmatprep.mubr.msk.f32.mxu1 %vm3501_vm1, %v3502_v1  ;;  %2821 = vmatprep.mubr.msk.f32.mxu0 %vm3501_vm1, %v3502_v1 }
 0x32c   :  { %3076 = vmatpush3.bf16.msra.mxu1 %v3691_v50  ;;  %3070 = vmatpush3.bf16.msra.mxu0 %v3689_v49 }
 0x32d   :  { %3077 = vmatprep.subr.bf16.mxu0 %v3500_v0  ;;  %3083 = vmatprep.subr.bf16.mxu1 %v3500_v0 }
 0x3fa   :  { %v534_v7 = vpop.f32.mrb[8].mxu0  ;;  %v642_v8 = vpop.f32.mrb[4].mxu1 }
 0x3fb   :  { %v535_v10 = vadd.f32 %v534_v7, %v459_v62  ;;  %v646_v11 = vadd.f32 %v642_v8, %v242_v5  ;;  %v2801_v12 = vpop.f32.mrb[9].mxu0  ;;  %v2812_v13 = vpop.f32.mrb[5].mxu1 }
 0x3fd   :  { %v538_v15 = vadd.f32 %v3746_v6, %v535_v10  ;;  %3208 = vtanh.f32 %v646_v11  ;;  %v2583_v20 = vmul.f32 -1.442695, %v646_v11 }
 0x3ff   :  { %3210 = vtanh.f32 %v538_v15  ;;  %v2581_v21 = vmul.f32 -1.442695, %v538_v15 }
 0x400   :  { %3212 = vpow2.f32 %v2583_v20 }
 0x401   :  { %3214 = vpow2.f32 %v2581_v21 }
 0x407   :  { %v3209_v16 = vpop.eup %3208 }
 0x408   :  { %656 = vrot.lane.b32.xlu0 %v3209_v16, %s3503_s22 }
 0x409   :  { %v3211_v19 = vpop.eup %3210 }
 0x40a   :  { %552 = vrot.lane.b32.xlu1 %v3211_v19, %s3503_s22  ;;  %v3213_v22 = vpop.eup %3212 }
 0x40b   :  { %v3215_v23 = vpop.eup %3214  ;;  %v650_v24 = vadd.f32 1.0, %v3213_v22 }
 0x40c   :  { %v542_v25 = vadd.f32 1.0, %v3215_v23 }
 0x40d   :  { %3216 = vrcp.f32 %v650_v24 }
 0x40e   :  { %547 = vrot.lane.b32.xlu1 %v286_v18, %s3504_s23  ;;  %3218 = vrcp.f32 %v542_v25 }
 0x417   :  { %v3217_v26 = vpop.eup %3216 }
 0x418   :  { %v3219_v29 = vpop.eup %3218  ;;  %v654_v33 = vmul.f32 %v3217_v26, %v3678_v35 }
 0x47a   :  { %v657_v27 = vpop.permute.xlu0 %656 }
 0x47b   :  { %v659_v28 = vmul.f32 %v3217_v26, %v657_v27 }
 0x47c   :  { %v553_v30 = vpop.permute.xlu1 %552 }
 0x47d   :  { %v555_v31 = vmul.f32 %v3219_v29, %v553_v30  ;;  %661 = vrot.lane.b32.xlu1 %v659_v28, %s3504_s23 }
 0x47f   :  { %557 = vrot.lane.b32.xlu0 %v555_v31, %s3504_s23 }
 0x480   :  { %v548_v32 = vpop.permute.xlu1 %547 }
 0x481   :  { %v550_v36 = vmul.f32 %v3219_v29, %v548_v32 }
 0x4ef   :  { %v662_v34 = vpop.permute.xlu1 %661 }
 0x4f0   :  { %v3755_v37 = vadd.f32 %v662_v34, %v654_v33 }
 0x4f1   :  { %v558_v38 = vpop.permute.xlu0 %557 }
 0x4f2   :  { %3220 = vtanh.f32 %v3755_v37  ;;  %v3758_v40 = vadd.f32 %v558_v38, %v550_v36 }
 0x4f4   :  { %3222 = vtanh.f32 %v3758_v40 }
 0x4fc   :  { %v3221_v41 = vpop.eup %3220 }
 0x4fd   :  { %667 = vrot.lane.b32.xlu1 %v3221_v41, %s3503_s22  ;;  %v252_v41 = vadd.f32 %v3714_v58, %v3670_v17 }
 0x4fe   :  { %v3223_v42 = vpop.eup %3222 }
 0x4ff   :  { %563 = vrot.lane.b32.xlu0 %v3223_v42, %s3503_s22 }
 0x56f   :  { %v668_v44 = vpop.permute.xlu1 %667 }
 0x570   :  { %v670_v45 = vmul.f32 %v3217_v26, %v668_v44 }
 0x571   :  { %v564_v35 = vpop.permute.xlu0 %563 }
 0x572   :  { %v566_v46 = vmul.f32 %v3219_v29, %v564_v35  ;;  %744 = vrot.lane.b32.xlu1 %v670_v45, %s3504_s23 }
 0x574   :  { %570 = vrot.lane.b32.xlu0 %v566_v46, %s3504_s23 }
 0x5e4   :  { %v745_v47 = vpop.permute.xlu1 %744 }
 0x5e5   :  { %845 = vst.msk [vmem:[#allocation16 + $0x8] sm:$0xff] %vm102_vm0, %v745_v47  ;;  %2833 = vmatmul.mubr.msk.f32.vlgmr.msra.gmra.mrb[6].mxu1 %vm102_vm0, %v745_v47 }
 0x5e6   :  { %v571_v48 = vpop.permute.xlu0 %570  ;;  %3085 = vmatpush3.bf16.msra.mxu1 %v3683_v43  ;;  %2854 = vmatprep.mubr.msk.f32.mxu1 %vm3501_vm1, %v3502_v1 }
 0x5e7   :  { %573 = vst.msk [vmem:[#allocation17] sm:$0xff] %vm102_vm0, %v571_v48  ;;  %2822 = vmatmul.mubr.msk.f32.vlgmr.msra.gmra.mrb[10].mxu0 %vm102_vm0, %v571_v48  ;;  %3086 = vmatprep.subr.bf16.mxu1 %v3500_v0 }
 0x5e8   :  { %3079 = vmatpush3.bf16.msra.mxu0 %v3653_v9  ;;  %2843 = vmatprep.mubr.msk.f32.mxu0 %vm3501_vm1, %v3502_v1 }
 0x5e9   :  { %3080 = vmatprep.subr.bf16.mxu0 %v3500_v0 }
 0x5ea   :  { %3088 = vmatpush3.bf16.msra.mxu1 %v3689_v49 }
 0x5eb   :  { %3095 = vmatprep.subr.bf16.mxu1 %v3500_v0 }
 0x5ec   :  { %3082 = vmatpush3.bf16.msra.mxu0 %v3657_v14 }
 0x5ed   :  { %3089 = vmatprep.subr.bf16.mxu0 %v3500_v0 }
 0x5ef   :  { %2844 = vmatmul.mubr.msk.f32.vlgmr.msra.gmra.mrb[12].mxu0 %vm102_vm0, %v745_v47 }
 0x5f0   :  { %3091 = vmatpush3.bf16.msra.mxu0 %v3681_v39  ;;  %2865 = vmatprep.mubr.msk.f32.mxu0 %vm3501_vm1, %v3502_v1 }
 0x5f1   :  { %3092 = vmatprep.subr.bf16.mxu0 %v3500_v0 }
 0x5f4   :  { %3094 = vmatpush3.bf16.msra.mxu0 %v3691_v50 }
 0x5f5   :  { %3101 = vmatprep.subr.bf16.mxu0 %v3500_v0 }
 0x6b8   :  { %v814_v51 = vpop.f32.mrb[6].mxu1 }
 0x6b9   :  { %v2834_v52 = vpop.f32.mrb[7].mxu1 }
 0x6ba   :  { %v739_v53 = vpop.f32.mrb[10].mxu0 }
 0x6bb   :  { %v815_v54 = vadd.f32 %v814_v51, %v739_v53  ;;  %v2823_v55 = vpop.f32.mrb[11].mxu0 }
 0x6bd   :  { %v818_v56 = vadd.f32 %v3746_v6, %v815_v54 }
 0x6bf   :  { %3224 = vtanh.f32 %v818_v56  ;;  %v2586_v8 = vmul.f32 -1.442695, %v818_v56 }
 0x6c2   :  { %v920_v62 = vpop.f32.mrb[12].mxu0 }
 0x6c3   :  { %v924_v2 = vadd.f32 %v920_v62, %v247_v57  ;;  %v2845_v4 = vpop.f32.mrb[13].mxu0 }
 0x6c5   :  { %3226 = vtanh.f32 %v924_v2  ;;  %v2588_v10 = vmul.f32 -1.442695, %v924_v2 }
 0x6c6   :  { %3228 = vpow2.f32 %v2586_v8 }
 0x6c7   :  { %3230 = vpow2.f32 %v2588_v10 }
 0x6c9   :  { %v3225_v5 = vpop.eup %3224 }
 0x6ca   :  { %828 = vrot.lane.b32.xlu0 %v3225_v5, %s3503_s22 }
 0x6cf   :  { %v3227_v7 = vpop.eup %3226 }
 0x6d0   :  { %934 = vrot.lane.b32.xlu1 %v3227_v7, %s3503_s22  ;;  %v3229_v11 = vpop.eup %3228 }
 0x6d1   :  { %v822_v12 = vadd.f32 1.0, %v3229_v11  ;;  %v3231_v13 = vpop.eup %3230 }
 0x6d2   :  { %v928_v15 = vadd.f32 1.0, %v3231_v13 }
 0x6d3   :  { %3232 = vrcp.f32 %v822_v12 }
 0x6d4   :  { %3234 = vrcp.f32 %v928_v15 }
 0x6dd   :  { %v3233_v59 = vpop.eup %3232 }
 0x6de   :  { %v3235_v18 = vpop.eup %3234  ;;  %v826_v22 = vmul.f32 %v3233_v59, %v3758_v40 }
 0x6df   :  { %v932_v25 = vmul.f32 %v3235_v18, %v3755_v37 }
 0x73c   :  { %v829_v16 = vpop.permute.xlu0 %828 }
 0x73d   :  { %v831_v19 = vmul.f32 %v3233_v59, %v829_v16 }
 0x73f   :  { %833 = vrot.lane.b32.xlu0 %v831_v19, %s3504_s23 }
 0x742   :  { %v935_v20 = vpop.permute.xlu1 %934 }
 0x743   :  { %v937_v21 = vmul.f32 %v3235_v18, %v935_v20 }
 0x745   :  { %939 = vrot.lane.b32.xlu1 %v937_v21, %s3504_s23 }
 0x7b1   :  { %v834_v23 = vpop.permute.xlu0 %833 }
 0x7b2   :  { %v3796_v24 = vadd.f32 %v834_v23, %v826_v22 }
 0x7b4   :  { %3236 = vtanh.f32 %v3796_v24 }
 0x7b7   :  { %v940_v26 = vpop.permute.xlu1 %939 }
 0x7b8   :  { %v3800_v27 = vadd.f32 %v940_v26, %v932_v25 }
 0x7ba   :  { %3238 = vtanh.f32 %v3800_v27 }
 0x7be   :  { %v3237_v28 = vpop.eup %3236 }
 0x7bf   :  { %839 = vrot.lane.b32.xlu0 %v3237_v28, %s3503_s22 }
 0x7c4   :  { %v3239_v29 = vpop.eup %3238 }
 0x7c5   :  { %945 = vrot.lane.b32.xlu1 %v3239_v29, %s3503_s22 }
 0x831   :  { %v840_v30 = vpop.permute.xlu0 %839 }
 0x832   :  { %v842_v31 = vmul.f32 %v3233_v59, %v840_v30  ;;  %v257_v30 = vadd.f32 %v3670_v17, %v3720_v61 }
 0x834   :  { %847 = vrot.lane.b32.xlu0 %v842_v31, %s3504_s23 }
 0x837   :  { %v946_v32 = vpop.permute.xlu1 %945 }
 0x838   :  { %v948_v33 = vmul.f32 %v3235_v18, %v946_v32 }
 0x83a   :  { %1022 = vrot.lane.b32.xlu1 %v948_v33, %s3504_s23 }
 0x8a6   :  { %v848_v34 = vpop.permute.xlu0 %847 }
 0x8a7   :  { %851 = vst.msk [vmem:[#allocation17 + $0x8] sm:$0xff] %vm102_vm0, %v848_v34  ;;  %2855 = vmatmul.mubr.msk.f32.vlgmr.msra.gmra.mrb[8].mxu1 %vm102_vm0, %v848_v34 }
 0x8a8   :  { %3097 = vmatpush3.bf16.msra.mxu1 %v3653_v9  ;;  %2876 = vmatprep.mubr.msk.f32.mxu1 %vm3501_vm1, %v3502_v1 }
 0x8a9   :  { %3098 = vmatprep.subr.bf16.mxu1 %v3500_v0 }
 0x8ac   :  { %v1023_v36 = vpop.permute.xlu1 %1022  ;;  %3100 = vmatpush3.bf16.msra.mxu1 %v3657_v14 }
 0x8ad   :  { %1123 = vst.msk [vmem:[#allocation16 + $0x10] sm:$0xff] %vm102_vm0, %v1023_v36  ;;  %2866 = vmatmul.mubr.msk.f32.vlgmr.msra.gmra.mrb[14].mxu0 %vm102_vm0, %v1023_v36  ;;  %3107 = vmatprep.subr.bf16.mxu1 %v3500_v0 }
 0x8ae   :  { %3103 = vmatpush3.bf16.msra.mxu0 %v3683_v43  ;;  %2887 = vmatprep.mubr.msk.f32.mxu0 %vm3501_vm1, %v3502_v1 }
 0x8af   :  { %2877 = vmatmul.mubr.msk.f32.vlgmr.msra.gmra.mrb[10].mxu1 %vm102_vm0, %v1023_v36  ;;  %3104 = vmatprep.subr.bf16.mxu0 %v3500_v0 }
 0x8b0   :  { %3109 = vmatpush3.bf16.msra.mxu1 %v3681_v39  ;;  %2898 = vmatprep.mubr.msk.f32.mxu1 %vm3501_vm1, %v3502_v1 }
 0x8b1   :  { %3110 = vmatprep.subr.bf16.mxu1 %v3500_v0 }
 0x8b2   :  { %3106 = vmatpush3.bf16.msra.mxu0 %v3689_v49 }
 0x8b3   :  { %3113 = vmatprep.subr.bf16.mxu0 %v3500_v0 }
 0x8b4   :  { %3112 = vmatpush3.bf16.msra.mxu1 %v3691_v50 }
 0x8b5   :  { %3119 = vmatprep.subr.bf16.mxu1 %v3500_v0 }
 0x97a   :  { %v1017_v37 = vpop.f32.mrb[8].mxu1 }
 0x97b   :  { %v2856_v38 = vpop.f32.mrb[9].mxu1 }
 0x980   :  { %v1092_v40 = vpop.f32.mrb[14].mxu0 }
 0x981   :  { %v1093_v42 = vadd.f32 %v1092_v40, %v1017_v37  ;;  %v2867_v44 = vpop.f32.mrb[15].mxu0 }
 0x982   :  { %v1198_v45 = vpop.f32.mrb[10].mxu1 }
 0x983   :  { %v1096_v35 = vadd.f32 %v3746_v6, %v1093_v42  ;;  %v1202_v46 = vadd.f32 %v1198_v45, %v252_v41  ;;  %v2878_v47 = vpop.f32.mrb[11].mxu1 }
 0x985   :  { %3240 = vtanh.f32 %v1096_v35  ;;  %v2591_v52 = vmul.f32 -1.442695, %v1096_v35  ;;  %v2593_v53 = vmul.f32 -1.442695, %v1202_v46 }
 0x986   :  { %3242 = vtanh.f32 %v1202_v46 }
 0x987   :  { %3244 = vpow2.f32 %v2591_v52 }
 0x988   :  { %3246 = vpow2.f32 %v2593_v53 }
 0x98f   :  { %v3241_v48 = vpop.eup %3240 }
 0x990   :  { %v3243_v51 = vpop.eup %3242  ;;  %1106 = vrot.lane.b32.xlu0 %v3241_v48, %s3503_s22 }
 0x991   :  { %1212 = vrot.lane.b32.xlu1 %v3243_v51, %s3503_s22  ;;  %v3245_v58 = vpop.eup %3244 }
 0x992   :  { %v3247_v54 = vpop.eup %3246  ;;  %v1100_v55 = vadd.f32 1.0, %v3245_v58 }
 0x993   :  { %v1206_v56 = vadd.f32 1.0, %v3247_v54 }
 0x994   :  { %3248 = vrcp.f32 %v1100_v55 }
 0x995   :  { %3250 = vrcp.f32 %v1206_v56 }
 0x99e   :  { %v3249_v57 = vpop.eup %3248 }
 0x99f   :  { %v3251_v2 = vpop.eup %3250  ;;  %v1104_v8 = vmul.f32 %v3249_v57, %v3796_v24 }
 0x9a0   :  { %v1210_v11 = vmul.f32 %v3251_v2, %v3800_v27 }
 0xa02   :  { %v1107_v62 = vpop.permute.xlu0 %1106 }
 0xa03   :  { %v1109_v4 = vmul.f32 %v3249_v57, %v1107_v62  ;;  %v1213_v5 = vpop.permute.xlu1 %1212 }
 0xa04   :  { %v1215_v7 = vmul.f32 %v3251_v2, %v1213_v5 }
 0xa05   :  { %1111 = vrot.lane.b32.xlu0 %v1109_v4, %s3504_s23 }
 0xa06   :  { %1217 = vrot.lane.b32.xlu1 %v1215_v7, %s3504_s23 }
 0xa77   :  { %v1112_v10 = vpop.permute.xlu0 %1111 }
 0xa78   :  { %v3839_v12 = vadd.f32 %v1112_v10, %v1104_v8  ;;  %v1218_v13 = vpop.permute.xlu1 %1217 }
 0xa79   :  { %v3841_v15 = vadd.f32 %v1218_v13, %v1210_v11 }
 0xa7a   :  { %3252 = vtanh.f32 %v3839_v12 }
 0xa7b   :  { %3254 = vtanh.f32 %v3841_v15 }
 0xa84   :  { %v3253_v59 = vpop.eup %3252 }
 0xa85   :  { %v3255_v16 = vpop.eup %3254  ;;  %1117 = vrot.lane.b32.xlu0 %v3253_v59, %s3503_s22  ;;  %v262_v59 = vadd.f32 %v3718_v60, %v3670_v17 }
 0xa86   :  { %1223 = vrot.lane.b32.xlu1 %v3255_v16, %s3503_s22 }
 0xaf7   :  { %v1118_v19 = vpop.permute.xlu0 %1117 }
 0xaf8   :  { %v1120_v18 = vmul.f32 %v3249_v57, %v1118_v19  ;;  %v1224_v20 = vpop.permute.xlu1 %1223 }
 0xaf9   :  { %v1226_v21 = vmul.f32 %v3251_v2, %v1224_v20 }
 0xafa   :  { %1125 = vrot.lane.b32.xlu0 %v1120_v18, %s3504_s23 }
 0xafb   :  { %1300 = vrot.lane.b32.xlu1 %v1226_v21, %s3504_s23 }
 0xb6c   :  { %v1126_v22 = vpop.permute.xlu0 %1125 }
 0xb6d   :  { %1129 = vst.msk [vmem:[#allocation17 + $0x10] sm:$0xff] %vm102_vm0, %v1126_v22  ;;  %v1301_v23 = vpop.permute.xlu1 %1300  ;;  %2888 = vmatmul.mubr.msk.f32.vlgmr.msra.gmra.mrb[16].mxu0 %vm102_vm0, %v1126_v22 }
 0xb6e   :  { %1401 = vst.msk [vmem:[#allocation16 + $0x18] sm:$0xff] %vm102_vm0, %v1301_v23  ;;  %2899 = vmatmul.mubr.msk.f32.vlgmr.msra.gmra.mrb[12].mxu1 %vm102_vm0, %v1301_v23  ;;  %3115 = vmatpush3.bf16.msra.mxu0 %v3653_v9 }
 0xb6f   :  { %3116 = vmatprep.subr.bf16.mxu0 %v3500_v0  ;;  %2909 = vmatprep.mubr.msk.f32.mxu0 %vm3501_vm1, %v3502_v1 }
 0xb70   :  { %3121 = vmatpush3.bf16.msra.mxu1 %v3683_v43  ;;  %2920 = vmatprep.mubr.msk.f32.mxu1 %vm3501_vm1, %v3502_v1 }
 0xb71   :  { %3122 = vmatprep.subr.bf16.mxu1 %v3500_v0 }
 0xb72   :  { %3118 = vmatpush3.bf16.msra.mxu0 %v3657_v14 }
 0xb73   :  { %3125 = vmatprep.subr.bf16.mxu0 %v3500_v0 }
 0xb74   :  { %3124 = vmatpush3.bf16.msra.mxu1 %v3689_v49 }
 0xb75   :  { %2910 = vmatmul.mubr.msk.f32.vlgmr.msra.gmra.mrb[18].mxu0 %vm102_vm0, %v1301_v23  ;;  %3131 = vmatprep.subr.bf16.mxu1 %v3500_v0 }
 0xb76   :  { %3127 = vmatpush3.bf16.msra.mxu0 %v3681_v39  ;;  %2931 = vmatprep.mubr.msk.f32.mxu0 %vm3501_vm1, %v3502_v1 }
 0xb77   :  { %3128 = vmatprep.subr.bf16.mxu0 %v3500_v0 }
 0xb7a   :  { %3130 = vmatpush3.bf16.msra.mxu0 %v3691_v50 }
 0xb7b   :  { %3137 = vmatprep.subr.bf16.mxu0 %v3500_v0 }
 0xc40   :  { %v1295_v24 = vpop.f32.mrb[16].mxu0 }
 0xc41   :  { %v1370_v25 = vpop.f32.mrb[12].mxu1  ;;  %v2889_v26 = vpop.f32.mrb[17].mxu0 }
 0xc42   :  { %v1371_v27 = vadd.f32 %v1370_v25, %v1295_v24  ;;  %v2900_v28 = vpop.f32.mrb[13].mxu1 }
 0xc44   :  { %v1374_v29 = vadd.f32 %v3746_v6, %v1371_v27 }
 0xc46   :  { %3256 = vtanh.f32 %v1374_v29  ;;  %v2596_v37 = vmul.f32 -1.442695, %v1374_v29 }
 0xc48   :  { %v1476_v31 = vpop.f32.mrb[18].mxu0 }
 0xc49   :  { %v1480_v32 = vadd.f32 %v1476_v31, %v257_v30  ;;  %v2911_v33 = vpop.f32.mrb[19].mxu0 }
 0xc4b   :  { %3258 = vtanh.f32 %v1480_v32  ;;  %v2598_v38 = vmul.f32 -1.442695, %v1480_v32 }
 0xc4c   :  { %3260 = vpow2.f32 %v2596_v37 }
 0xc4d   :  { %3262 = vpow2.f32 %v2598_v38 }
 0xc50   :  { %v3257_v34 = vpop.eup %3256 }
 0xc51   :  { %1384 = vrot.lane.b32.xlu0 %v3257_v34, %s3503_s22 }
 0xc55   :  { %v3259_v36 = vpop.eup %3258 }
 0xc56   :  { %1490 = vrot.lane.b32.xlu1 %v3259_v36, %s3503_s22  ;;  %v3261_v40 = vpop.eup %3260 }
 0xc57   :  { %v1378_v41 = vadd.f32 1.0, %v3261_v40  ;;  %v3263_v42 = vpop.eup %3262 }
 0xc58   :  { %v1484_v44 = vadd.f32 1.0, %v3263_v42 }
 0xc59   :  { %3264 = vrcp.f32 %v1378_v41 }
 0xc5a   :  { %3266 = vrcp.f32 %v1484_v44 }
 0xc63   :  { %v3265_v61 = vpop.eup %3264 }
 0xc64   :  { %v3267_v46 = vpop.eup %3266  ;;  %v1382_v51 = vmul.f32 %v3265_v61, %v3839_v12 }
 0xc65   :  { %v1488_v58 = vmul.f32 %v3267_v46, %v3841_v15 }
 0xcc3   :  { %v1385_v45 = vpop.permute.xlu0 %1384 }
 0xcc4   :  { %v1387_v35 = vmul.f32 %v3265_v61, %v1385_v45 }
 0xcc6   :  { %1389 = vrot.lane.b32.xlu0 %v1387_v35, %s3504_s23 }
 0xcc8   :  { %v1491_v47 = vpop.permute.xlu1 %1490 }
 0xcc9   :  { %v1493_v48 = vmul.f32 %v3267_v46, %v1491_v47 }
 0xccb   :  { %1495 = vrot.lane.b32.xlu1 %v1493_v48, %s3504_s23 }
 0xd38   :  { %v1390_v52 = vpop.permute.xlu0 %1389 }
 0xd39   :  { %v3880_v53 = vadd.f32 %v1390_v52, %v1382_v51 }
 0xd3b   :  { %3268 = vtanh.f32 %v3880_v53 }
 0xd3d   :  { %v1496_v54 = vpop.permute.xlu1 %1495 }
 0xd3e   :  { %v3884_v55 = vadd.f32 %v1496_v54, %v1488_v58 }
 0xd40   :  { %3270 = vtanh.f32 %v3884_v55 }
 0xd45   :  { %v3269_v56 = vpop.eup %3268 }
 0xd46   :  { %1395 = vrot.lane.b32.xlu0 %v3269_v56, %s3503_s22  ;;  %v267_v56 = vadd.f32 %v3670_v17, %v3724_v3 }
 0xd4a   :  { %v3271_v57 = vpop.eup %3270 }
 0xd4b   :  { %1501 = vrot.lane.b32.xlu1 %v3271_v57, %s3503_s22 }
 0xdb8   :  { %v1396_v62 = vpop.permute.xlu0 %1395 }
 0xdb9   :  { %v1398_v2 = vmul.f32 %v3265_v61, %v1396_v62 }
 0xdbb   :  { %1403 = vrot.lane.b32.xlu0 %v1398_v2, %s3504_s23 }
 0xdbd   :  { %v1502_v4 = vpop.permute.xlu1 %1501 }
 0xdbe   :  { %v1504_v5 = vmul.f32 %v3267_v46, %v1502_v4 }
 0xdc0   :  { %1578 = vrot.lane.b32.xlu1 %v1504_v5, %s3504_s23 }
 0xe2d   :  { %v1404_v7 = vpop.permute.xlu0 %1403 }
 0xe2e   :  { %1407 = vst.msk [vmem:[#allocation17 + $0x18] sm:$0xff] %vm102_vm0, %v1404_v7  ;;  %2921 = vmatmul.mubr.msk.f32.vlgmr.msra.gmra.mrb[14].mxu1 %vm102_vm0, %v1404_v7 }
 0xe2f   :  { %3133 = vmatpush3.bf16.msra.mxu1 %v3653_v9  ;;  %2942 = vmatprep.mubr.msk.f32.mxu1 %vm3501_vm1, %v3502_v1 }
 0xe30   :  { %3134 = vmatprep.subr.bf16.mxu1 %v3500_v0 }
 0xe32   :  { %v1579_v8 = vpop.permute.xlu1 %1578 }
 0xe33   :  { %1679 = vst.msk [vmem:[#allocation16 + $0x20] sm:$0xff] %vm102_vm0, %v1579_v8  ;;  %3136 = vmatpush3.bf16.msra.mxu1 %v3657_v14  ;;  %2932 = vmatmul.mubr.msk.f32.vlgmr.msra.gmra.mrb[20].mxu0 %vm102_vm0, %v1579_v8 }
 0xe34   :  { %3139 = vmatpush3.bf16.msra.mxu0 %v3683_v43  ;;  %3143 = vmatprep.subr.bf16.mxu1 %v3500_v0 }
 0xe35   :  { %3140 = vmatprep.subr.bf16.mxu0 %v3500_v0  ;;  %2953 = vmatprep.mubr.msk.f32.mxu0 %vm3501_vm1, %v3502_v1 }
 0xe36   :  { %2943 = vmatmul.mubr.msk.f32.vlgmr.msra.gmra.mrb[16].mxu1 %vm102_vm0, %v1579_v8 }
 0xe37   :  { %3145 = vmatpush3.bf16.msra.mxu1 %v3681_v39  ;;  %2964 = vmatprep.mubr.msk.f32.mxu1 %vm3501_vm1, %v3502_v1 }
 0xe38   :  { %3142 = vmatpush3.bf16.msra.mxu0 %v3689_v49  ;;  %3146 = vmatprep.subr.bf16.mxu1 %v3500_v0 }
 0xe39   :  { %3149 = vmatprep.subr.bf16.mxu0 %v3500_v0 }
 0xe3b   :  { %3148 = vmatpush3.bf16.msra.mxu1 %v3691_v50 }
 0xe3c   :  { %3155 = vmatprep.subr.bf16.mxu1 %v3500_v0 }
 0xf01   :  { %v1573_v10 = vpop.f32.mrb[14].mxu1 }
 0xf02   :  { %v2922_v11 = vpop.f32.mrb[15].mxu1 }
 0xf06   :  { %v1648_v12 = vpop.f32.mrb[20].mxu0 }
 0xf07   :  { %v1649_v13 = vadd.f32 %v1648_v12, %v1573_v10  ;;  %v2933_v15 = vpop.f32.mrb[21].mxu0 }
 0xf09   :  { %v1652_v16 = vadd.f32 %v3746_v6, %v1649_v13  ;;  %v1754_v19 = vpop.f32.mrb[16].mxu1 }
 0xf0a   :  { %v1758_v18 = vadd.f32 %v1754_v19, %v262_v59  ;;  %v2944_v20 = vpop.f32.mrb[17].mxu1 }
 0xf0b   :  { %3272 = vtanh.f32 %v1652_v16  ;;  %v2601_v23 = vmul.f32 -1.442695, %v1652_v16 }
 0xf0c   :  { %3274 = vtanh.f32 %v1758_v18  ;;  %v2603_v24 = vmul.f32 -1.442695, %v1758_v18 }
 0xf0d   :  { %3276 = vpow2.f32 %v2601_v23 }
 0xf0e   :  { %3278 = vpow2.f32 %v2603_v24 }
 0xf15   :  { %v3273_v21 = vpop.eup %3272 }
 0xf16   :  { %v3275_v22 = vpop.eup %3274  ;;  %1662 = vrot.lane.b32.xlu0 %v3273_v21, %s3503_s22 }
 0xf17   :  { %1768 = vrot.lane.b32.xlu1 %v3275_v22, %s3503_s22  ;;  %v3277_v25 = vpop.eup %3276 }
 0xf18   :  { %v3279_v26 = vpop.eup %3278  ;;  %v1656_v60 = vadd.f32 1.0, %v3277_v25 }
 0xf19   :  { %v1762_v27 = vadd.f32 1.0, %v3279_v26 }
 0xf1a   :  { %3280 = vrcp.f32 %v1656_v60 }
 0xf1b   :  { %3282 = vrcp.f32 %v1762_v27 }
 0xf24   :  { %v3281_v28 = vpop.eup %3280 }
 0xf25   :  { %v3283_v30 = vpop.eup %3282  ;;  %v1660_v34 = vmul.f32 %v3281_v28, %v3880_v53 }
 0xf26   :  { %v1766_v37 = vmul.f32 %v3283_v30, %v3884_v55 }
 0xf88   :  { %v1663_v29 = vpop.permute.xlu0 %1662 }
 0xf89   :  { %v1665_v31 = vmul.f32 %v3281_v28, %v1663_v29  ;;  %v1769_v32 = vpop.permute.xlu1 %1768 }
 0xf8a   :  { %v1771_v33 = vmul.f32 %v3283_v30, %v1769_v32 }
 0xf8b   :  { %1667 = vrot.lane.b32.xlu0 %v1665_v31, %s3504_s23 }
 0xf8c   :  { %1773 = vrot.lane.b32.xlu1 %v1771_v33, %s3504_s23 }
 0xffd   :  { %v1668_v36 = vpop.permute.xlu0 %1667 }
 0xffe   :  { %v3923_v38 = vadd.f32 %v1668_v36, %v1660_v34  ;;  %v1774_v40 = vpop.permute.xlu1 %1773  ;;  %v3328_v34 = vld [vmem:[%s4058_s3] ss:$0 sm:$0xff]  ;;  %s3505_s3 = smov 96  }
 0xfff   :  { %v3925_v41 = vadd.f32 %v1774_v40, %v1766_v37 }
0x1000   :  { %3284 = vtanh.f32 %v3923_v38 }
0x1001   :  { %3286 = vtanh.f32 %v3925_v41 }
0x100a   :  { %v3285_v42 = vpop.eup %3284 }
0x100b   :  { %v3287_v44 = vpop.eup %3286  ;;  %1673 = vrot.lane.b32.xlu0 %v3285_v42, %s3503_s22 }
0x100c   :  { %1779 = vrot.lane.b32.xlu1 %v3287_v44, %s3503_s22 }
0x107d   :  { %v1674_v61 = vpop.permute.xlu0 %1673 }
0x107e   :  { %v1676_v45 = vmul.f32 %v3281_v28, %v1674_v61  ;;  %v1780_v35 = vpop.permute.xlu1 %1779 }
0x107f   :  { %v1782_v46 = vmul.f32 %v3283_v30, %v1780_v35 }
0x1080   :  { %1681 = vrot.lane.b32.xlu0 %v1676_v45, %s3504_s23 }
0x1081   :  { %1856 = vrot.lane.b32.xlu1 %v1782_v46, %s3504_s23 }
0x10f2   :  { %v1682_v47 = vpop.permute.xlu0 %1681 }
0x10f3   :  { %1685 = vst.msk [vmem:[#allocation17 + $0x20] sm:$0xff] %vm102_vm0, %v1682_v47  ;;  %v1857_v48 = vpop.permute.xlu1 %1856  ;;  %2954 = vmatmul.mubr.msk.f32.vlgmr.msra.gmra.mrb[22].mxu0 %vm102_vm0, %v1682_v47 }
0x10f4   :  { %1957 = vst.msk [vmem:[#allocation16 + $0x28] sm:$0xff] %vm102_vm0, %v1857_v48  ;;  %2965 = vmatmul.mubr.msk.f32.vlgmr.msra.gmra.mrb[18].mxu1 %vm102_vm0, %v1857_v48  ;;  %3151 = vmatpush3.bf16.msra.mxu0 %v3653_v9 }
0x10f5   :  { %3152 = vmatprep.subr.bf16.mxu0 %v3500_v0  ;;  %2975 = vmatprep.mubr.msk.f32.mxu0 %vm3501_vm1, %v3502_v1 }
0x10f6   :  { %3157 = vmatpush3.bf16.msra.mxu1 %v3683_v43  ;;  %2986 = vmatprep.mubr.msk.f32.mxu1 %vm3501_vm1, %v3502_v1 }
0x10f7   :  { %3158 = vmatprep.subr.bf16.mxu1 %v3500_v0 }
0x10f8   :  { %3154 = vmatpush3.bf16.msra.mxu0 %v3657_v14 }
0x10f9   :  { %3161 = vmatprep.subr.bf16.mxu0 %v3500_v0 }
0x10fa   :  { %3160 = vmatpush3.bf16.msra.mxu1 %v3689_v49 }
0x10fb   :  { %2976 = vmatmul.mubr.msk.f32.vlgmr.msra.gmra.mrb[24].mxu0 %vm102_vm0, %v1857_v48  ;;  %3167 = vmatprep.subr.bf16.mxu1 %v3500_v0 }
0x10fc   :  { %3163 = vmatpush3.bf16.msra.mxu0 %v3681_v39  ;;  %2997 = vmatprep.mubr.msk.f32.mxu0 %vm3501_vm1, %v3502_v1 }
0x10fd   :  { %3164 = vmatprep.subr.bf16.mxu0 %v3500_v0 }
0x1100   :  { %3166 = vmatpush3.bf16.msra.mxu0 %v3691_v50 }
0x1101   :  { %3173 = vmatprep.subr.bf16.mxu0 %v3500_v0 }
0x11c6   :  { %v1851_v51 = vpop.f32.mrb[22].mxu0 }
0x11c7   :  { %v1926_v52 = vpop.f32.mrb[18].mxu1  ;;  %v2955_v53 = vpop.f32.mrb[23].mxu0 }
0x11c8   :  { %v1927_v58 = vadd.f32 %v1926_v52, %v1851_v51  ;;  %v2966_v54 = vpop.f32.mrb[19].mxu1 }
0x11ca   :  { %v1930_v55 = vadd.f32 %v3746_v6, %v1927_v58 }
0x11cc   :  { %3288 = vtanh.f32 %v1930_v55  ;;  %v2606_v7 = vmul.f32 -1.442695, %v1930_v55 }
0x11ce   :  { %v2032_v57 = vpop.f32.mrb[24].mxu0 }
0x11cf   :  { %v2036_v62 = vadd.f32 %v2032_v57, %v267_v56  ;;  %v2977_v2 = vpop.f32.mrb[25].mxu0 }
0x11d1   :  { %3290 = vtanh.f32 %v2036_v62  ;;  %v2608_v8 = vmul.f32 -1.442695, %v2036_v62 }
0x11d2   :  { %3292 = vpow2.f32 %v2606_v7 }
0x11d3   :  { %3294 = vpow2.f32 %v2608_v8 }
0x11d6   :  { %v3289_v4 = vpop.eup %3288 }
0x11d7   :  { %1940 = vrot.lane.b32.xlu0 %v3289_v4, %s3503_s22 }
0x11db   :  { %v3291_v5 = vpop.eup %3290 }
0x11dc   :  { %2046 = vrot.lane.b32.xlu1 %v3291_v5, %s3503_s22  ;;  %v3293_v10 = vpop.eup %3292 }
0x11dd   :  { %v1934_v11 = vadd.f32 1.0, %v3293_v10  ;;  %v3295_v12 = vpop.eup %3294 }
0x11de   :  { %v2040_v13 = vadd.f32 1.0, %v3295_v12 }
0x11df   :  { %3296 = vrcp.f32 %v1934_v11 }
0x11e0   :  { %3298 = vrcp.f32 %v2040_v13 }
0x11e9   :  { %v3297_v17 = vpop.eup %3296 }
0x11ea   :  { %v3299_v59 = vpop.eup %3298  ;;  %v1938_v18 = vmul.f32 %v3297_v17, %v3923_v38 }
0x11eb   :  { %v2044_v22 = vmul.f32 %v3299_v59, %v3925_v41 }
0x1249   :  { %v1941_v3 = vpop.permute.xlu0 %1940 }
0x124a   :  { %v1943_v15 = vmul.f32 %v3297_v17, %v1941_v3 }
0x124c   :  { %1945 = vrot.lane.b32.xlu0 %v1943_v15, %s3504_s23 }
0x124e   :  { %v2047_v16 = vpop.permute.xlu1 %2046 }
0x124f   :  { %v2049_v19 = vmul.f32 %v3299_v59, %v2047_v16 }
0x1251   :  { %2051 = vrot.lane.b32.xlu1 %v2049_v19, %s3504_s23 }
0x12be   :  { %v1946_v20 = vpop.permute.xlu0 %1945 }
0x12bf   :  { %v3964_v21 = vadd.f32 %v1946_v20, %v1938_v18 }
0x12c1   :  { %3300 = vtanh.f32 %v3964_v21 }
0x12c3   :  { %v2052_v23 = vpop.permute.xlu1 %2051 }
0x12c4   :  { %v3968_v24 = vadd.f32 %v2052_v23, %v2044_v22 }
0x12c6   :  { %3302 = vtanh.f32 %v3968_v24 }
0x12cb   :  { %v3301_v25 = vpop.eup %3300 }
0x12cc   :  { %1951 = vrot.lane.b32.xlu0 %v3301_v25, %s3503_s22 }
0x12d0   :  { %v3303_v26 = vpop.eup %3302 }
0x12d1   :  { %2057 = vrot.lane.b32.xlu1 %v3303_v26, %s3503_s22 }
0x133e   :  { %v1952_v60 = vpop.permute.xlu0 %1951 }
0x133f   :  { %v1954_v27 = vmul.f32 %v3297_v17, %v1952_v60 }
0x1341   :  { %1959 = vrot.lane.b32.xlu0 %v1954_v27, %s3504_s23 }
0x1343   :  { %v2058_v28 = vpop.permute.xlu1 %2057 }
0x1344   :  { %v2060_v29 = vmul.f32 %v3299_v59, %v2058_v28 }
0x1346   :  { %2134 = vrot.lane.b32.xlu1 %v2060_v29, %s3504_s23 }
0x13b3   :  { %v1960_v30 = vpop.permute.xlu0 %1959 }
0x13b4   :  { %1963 = vst.msk [vmem:[#allocation17 + $0x28] sm:$0xff] %vm102_vm0, %v1960_v30  ;;  %2987 = vmatmul.mubr.msk.f32.vlgmr.msra.gmra.mrb[20].mxu1 %vm102_vm0, %v1960_v30 }
0x13b5   :  { %3169 = vmatpush3.bf16.msra.mxu1 %v3653_v9  ;;  %3008 = vmatprep.mubr.msk.f32.mxu1 %vm3501_vm1, %v3502_v1 }
0x13b6   :  { %3170 = vmatprep.subr.bf16.mxu1 %v3500_v0 }
0x13b8   :  { %v2135_v31 = vpop.permute.xlu1 %2134 }
0x13b9   :  { %2235 = vst.msk [vmem:[#allocation16 + $0x30] sm:$0xff] %vm102_vm0, %v2135_v31  ;;  %3172 = vmatpush3.bf16.msra.mxu1 %v3657_v14  ;;  %2998 = vmatmul.mubr.msk.f32.vlgmr.msra.gmra.mrb[26].mxu0 %vm102_vm0, %v2135_v31 }
0x13ba   :  { %3179 = vmatprep.subr.bf16.mxu1 %v3500_v0  ;;  %3175 = vmatpush3.bf16.msra.mxu0 %v3683_v43 }
0x13bb   :  { %3176 = vmatprep.subr.bf16.mxu0 %v3500_v0  ;;  %3019 = vmatprep.mubr.msk.f32.mxu0 %vm3501_vm1, %v3502_v1 }
0x13bc   :  { %3009 = vmatmul.mubr.msk.f32.vlgmr.msra.gmra.mrb[22].mxu1 %vm102_vm0, %v2135_v31 }
0x13bd   :  { %3181 = vmatpush3.bf16.msra.mxu1 %v3681_v39  ;;  %3030 = vmatprep.mubr.msk.f32.mxu1 %vm3501_vm1, %v3502_v1  ;;  %v272_v39 = vadd.f32 %v3328_v34, %v3722_v63 }
0x13be   :  { %3182 = vmatprep.subr.bf16.mxu1 %v3500_v0  ;;  %3178 = vmatpush3.bf16.msra.mxu0 %v3689_v49 }
0x13c1   :  { %3184 = vmatpush3.bf16.msra.mxu1 %v3691_v50 }
0x1487   :  { %v2129_v9 = vpop.f32.mrb[20].mxu1 }
0x1488   :  { %v2988_v14 = vpop.f32.mrb[21].mxu1 }
0x148c   :  { %v2204_v43 = vpop.f32.mrb[26].mxu0 }
0x148d   :  { %v2205_v32 = vadd.f32 %v2204_v43, %v2129_v9  ;;  %v2999_v33 = vpop.f32.mrb[27].mxu0 }
0x148f   :  { %v2208_v36 = vadd.f32 %v3746_v6, %v2205_v32  ;;  %v2310_v1 = vpop.f32.mrb[22].mxu1 }
0x1490   :  { %v2314_v37 = vadd.f32 %v2310_v1, %v272_v39  ;;  %v3010_v0 = vpop.f32.mrb[23].mxu1 }
0x1491   :  { %3304 = vtanh.f32 %v2208_v36  ;;  %v2611_v38 = vmul.f32 -1.442695, %v2208_v36 }
0x1492   :  { %3306 = vtanh.f32 %v2314_v37  ;;  %v2613_v40 = vmul.f32 -1.442695, %v2314_v37 }
0x1493   :  { %3308 = vpow2.f32 %v2611_v38 }
0x1494   :  { %3310 = vpow2.f32 %v2613_v40 }
0x149b   :  { %v3305_v49 = vpop.eup %3304 }
0x149c   :  { %v3307_v50 = vpop.eup %3306  ;;  %2218 = vrot.lane.b32.xlu0 %v3305_v49, %s3503_s22 }
0x149d   :  { %2324 = vrot.lane.b32.xlu1 %v3307_v50, %s3503_s22  ;;  %v3309_v41 = vpop.eup %3308 }
0x149e   :  { %v3311_v42 = vpop.eup %3310  ;;  %v2212_v63 = vadd.f32 1.0, %v3309_v41 }
0x149f   :  { %v2318_v44 = vadd.f32 1.0, %v3311_v42 }
0x14a0   :  { %3312 = vrcp.f32 %v2212_v63 }
0x14a1   :  { %3314 = vrcp.f32 %v2318_v44 }
0x14aa   :  { %v3313_v61 = vpop.eup %3312 }
0x14ab   :  { %v3315_v35 = vpop.eup %3314  ;;  %v2216_v51 = vmul.f32 %v3313_v61, %v3964_v21 }
0x14ac   :  { %v2322_v53 = vmul.f32 %v3315_v35, %v3968_v24 }
0x150e   :  { %v2219_v45 = vpop.permute.xlu0 %2218 }
0x150f   :  { %v2221_v46 = vmul.f32 %v3313_v61, %v2219_v45  ;;  %v2325_v47 = vpop.permute.xlu1 %2324 }
0x1510   :  { %v2327_v48 = vmul.f32 %v3315_v35, %v2325_v47 }
0x1511   :  { %2223 = vrot.lane.b32.xlu0 %v2221_v46, %s3504_s23 }
0x1512   :  { %2329 = vrot.lane.b32.xlu1 %v2327_v48, %s3504_s23 }
0x1583   :  { %v2224_v52 = vpop.permute.xlu0 %2223 }
0x1584   :  { %v2226_v58 = vadd.f32 %v2224_v52, %v2216_v51  ;;  %v2330_v54 = vpop.permute.xlu1 %2329 }
0x1585   :  { %v2332_v55 = vadd.f32 %v2330_v54, %v2322_v53 }
0x1586   :  { %3316 = vtanh.f32 %v2226_v58 }
0x1587   :  { %3318 = vtanh.f32 %v2332_v55 }
0x1590   :  { %v3317_v56 = vpop.eup %3316 }
0x1591   :  { %v3319_v57 = vpop.eup %3318  ;;  %2229 = vrot.lane.b32.xlu0 %v3317_v56, %s3503_s22 }
0x1592   :  { %2335 = vrot.lane.b32.xlu1 %v3319_v57, %s3503_s22 }
0x1603   :  { %v2230_v62 = vpop.permute.xlu0 %2229 }
0x1604   :  { %v2232_v2 = vmul.f32 %v3313_v61, %v2230_v62  ;;  %v2336_v4 = vpop.permute.xlu1 %2335 }
0x1605   :  { %v2338_v5 = vmul.f32 %v3315_v35, %v2336_v4 }
0x1606   :  { %2237 = vrot.lane.b32.xlu0 %v2232_v2, %s3504_s23 }
0x1607   :  { %2412 = vrot.lane.b32.xlu1 %v2338_v5, %s3504_s23 }
0x1678   :  { %v2238_v7 = vpop.permute.xlu0 %2237 }
0x1679   :  { %2241 = vst.msk [vmem:[#allocation17 + $0x30] sm:$0xff] %vm102_vm0, %v2238_v7  ;;  %v2413_v8 = vpop.permute.xlu1 %2412  ;;  %3020 = vmatmul.mubr.msk.f32.vlgmr.msra.gmra.mrb[28].mxu0 %vm102_vm0, %v2238_v7 }
0x167a   :  { %2513 = vst.msk [vmem:[#allocation16 + $0x38] sm:$0xff] %vm102_vm0, %v2413_v8  ;;  %2520 = vst.msk [vmem:[#allocation3] sm:$0xff] %vm102_vm0, %v2413_v8  ;;  %3031 = vmatmul.mubr.msk.f32.vlgmr.msra.gmra.mrb[24].mxu1 %vm102_vm0, %v2413_v8 }
0x174c   :  { %v2407_v10 = vpop.f32.mrb[28].mxu0 }
0x174d   :  { %v2482_v11 = vpop.f32.mrb[24].mxu1  ;;  %v3021_v12 = vpop.f32.mrb[29].mxu0 }
0x174e   :  { %v2483_v13 = vadd.f32 %v2482_v11, %v2407_v10  ;;  %v3032_v17 = vpop.f32.mrb[25].mxu1 }
0x1750   :  { %v2486_v3 = vadd.f32 %v3746_v6, %v2483_v13 }
0x1752   :  { %3320 = vtanh.f32 %v2486_v3  ;;  %v2616_v59 = vmul.f32 -1.442695, %v2486_v3 }
0x1754   :  { %3322 = vpow2.f32 %v2616_v59 }
0x175c   :  { %v3321_v15 = vpop.eup %3320 }
0x175d   :  { %2496 = vrot.lane.b32.xlu0 %v3321_v15, %s3503_s22 }
0x175e   :  { %v3323_v16 = vpop.eup %3322 }
0x175f   :  { %v2490_v19 = vadd.f32 1.0, %v3323_v16 }
0x1761   :  { %3324 = vrcp.f32 %v2490_v19 }
0x176b   :  { %v3325_v18 = vpop.eup %3324 }
0x176c   :  { %v2494_v22 = vmul.f32 %v3325_v18, %v2226_v58 }
0x17cf   :  { %v2497_v20 = vpop.permute.xlu0 %2496 }
0x17d0   :  { %v2499_v21 = vmul.f32 %v3325_v18, %v2497_v20 }
0x17d2   :  { %2501 = vrot.lane.b32.xlu1 %v2499_v21, %s3504_s23 }
0x1844   :  { %v2502_v23 = vpop.permute.xlu1 %2501 }
0x1845   :  { %v2504_v24 = vadd.f32 %v2502_v23, %v2494_v22 }
0x1847   :  { %3326 = vtanh.f32 %v2504_v24 }
0x1851   :  { %v3327_v25 = vpop.eup %3326 }
0x1852   :  { %2507 = vrot.lane.b32.xlu0 %v3327_v25, %s3503_s22 }
0x1856   :  { %2522 = vrot.lane.b32.xlu0 %v2332_v55, %s3505_s3 }
0x1857   :  { %3450 = shalt.err (!%p3447_p2)
}
0x1858   :  { %s3451_s9 = scalar_lea.hbm %s4062_s7, 1024 }
0x1859   :  { %p3452_p3 = scmp.ne.s32.totalorder %s4062_s7, %s3451_s9  ;;  %p3455_p4 = scmp.lt.u32.totalorder %s3451_s9, %s4062_s7 }
0x185b   :  { %p3457_p5 = pnand %p3455_p4, %p3452_p3 }
0x185d   :  { %3460 = shalt.err (!%p3457_p5)
}
0x185e   :  { %2543 = dma.vmem_to_hbm [thread:$0]  %s2538_s29, 1024, %s4062_s7, [#allocation9], %s3495_s17, %s3495_s17, %s3496_s18  }
0x185f   :  { %s3507_s19 = smov [#allocation17]  }
0x1860   :  { %s2549_s20 = sshll.u32 %s3507_s19, 4  ;;  %s2550_s20 = int_to_ptr.vmem [resolvable:$true] %s2549_s20 }
0x1861   :  { %s3461_s21 = scalar_lea.vmem %s2550_s20, 1024  ;;  %p3466_p7 = scmp.lt.s32.totalorder %s2550_s20, %s2550_s20 }
0x1862   :  { %p3462_p6 = scmp.ne.s32.totalorder %s2550_s20, %s3461_s21  ;;  %p3467_p8 = scmp.lt.s32.totalorder %s3461_s21, %s3461_s21 }
0x1864   :  { %p3468_p9 = por %p3467_p8, %p3466_p7 }
0x1866   :  { %p3469_p10 = pnand %p3468_p9, %p3462_p6 }
0x18c4   :  { %v2508_v6 = vpop.permute.xlu0 %2507 }
0x18c5   :  { %v2510_v26 = vmul.f32 %v3325_v18, %v2508_v6 }
0x18c7   :  { %2515 = vrot.lane.b32.xlu1 %v2510_v26, %s3504_s23 }
0x18c8   :  { %v2523_v60 = vpop.permute.xlu0 %2522 }
0x18c9   :  { %2525 = vst.msk [vmem:[#allocation4] sm:$0xff] %vm102_vm0, %v2523_v60 }
0x18cb   :  { %2528 = vrot.lane.b32.xlu1 %v2504_v24, %s3505_s3 }
0x1939   :  { %v2516_v27 = vpop.permute.xlu1 %2515 }
0x193a   :  { %2519 = vst.msk [vmem:[#allocation17 + $0x38] sm:$0xff] %vm102_vm0, %v2516_v27  ;;  %2526 = vst.msk [vmem:[#allocation5] sm:$0xff] %vm102_vm0, %v2516_v27 }
0x193b   :  { %3472 = shalt.err (!%p3469_p10)
}
0x193c   :  { %s3473_s2 = scalar_lea.hbm %s4063_s8, 1024 }
0x193d   :  { %p3474_p11 = scmp.ne.s32.totalorder %s4063_s8, %s3473_s2  ;;  %p3477_p12 = scmp.lt.u32.totalorder %s3473_s2, %s4063_s8 }
0x193f   :  { %p3479_p13 = pnand %p3477_p12, %p3474_p11 }
0x1941   :  { %3482 = shalt.err (!%p3479_p13)
}
0x1942   :  { %2555 = dma.vmem_to_hbm [thread:$0]  %s2550_s20, 1024, %s4063_s8, [#allocation18], %s3495_s17, %s3495_s17, %s3496_s18   ;;  %v2529_v28 = vpop.permute.xlu1 %2528 }
0x1943   :  { %2531 = vst.msk [vmem:[#allocation6] sm:$0xff] %vm102_vm0, %v2529_v28 }
0x1944   :  { %3489 = dma.done.wait [#allocation9], 1024  }
0x1945   :  { %3490 = vsyncadd [#allocation9], 4294966272 }
0x1946   :  { %3491 = dma.done.wait [#allocation18], 1024  }
0x1947   :  { %3492 = vsyncadd [#allocation18], 4294966272 }
0x1948   :  { %2562 = vsyncpa [#allocation8], 1 }
0x1949   :  { %2563 = vsyncpa [#allocation11], 1 }
0x194a   :  { %2564 = vsyncpa [#allocation14], 1 }
0x194b   :  { %2565 = vsyncpa [#allocation9], 1 }
0x194c   :  { %2566 = vsyncpa [#allocation18], 1 }

</bundles_post_ra>
